<compile_context>
chip_gen: v7x
topology: tpu7x:2x2x1
jax: 0.10.0
libtpu: 0.0.40
codegen_flags: <defaults>
</compile_context>

<pallas_src>
import math

import jax
import jax.numpy as jnp
from jax.experimental import pallas as pl
from jax.experimental.pallas import tpu as pltpu

# ---------------- GPTConfig (small, deterministic) ----------------
VOCAB_SIZE = 64
BLOCK_SIZE = 16
N_EMBED = 32
N_HEAD = 4
N_LAYERS = 2
HEAD_DIM = N_EMBED // N_HEAD
LN_EPS = 1e-5          # torch.nn.LayerNorm default
INIT_STD = 0.02
V_PAD = 128            # lm_head columns padded to one full 128-lane tile
QKV_PAD = 128          # fused qkv columns padded 3*C=96 -> 128


# ---------------- in-kernel helpers ----------------
def _ln(x, w, b):
    # LayerNorm over last axis (PyTorch semantics, eps=1e-5), f32 math.
    mu = jnp.mean(x, axis=-1, keepdims=True)
    xc = x - mu
    var = jnp.mean(xc * xc, axis=-1, keepdims=True)
    return xc * jax.lax.rsqrt(var + LN_EPS) * w + b


def _gelu_tanh(x):
    # nanoGPT uses nn.GELU(approximate='tanh'); keep in f32 on the VPU/EUP.
    c = math.sqrt(2.0 / math.pi)
    return 0.5 * x * (1.0 + jnp.tanh(c * (x + 0.044715 * x * x * x)))


# ---------------- fused GPT kernel (one sequence per grid step) ------------
def _gpt_kernel(idx_ref, wte_ref, wpe_ref, ln_ref,
                wqkv_ref, bsm_ref, wpr_ref, wfc_ref, wmlp_ref, bfc_ref,
                wlm_ref, o_ref):
    T = idx_ref.shape[0]                     # rows of this sequence
    C, H, D = N_EMBED, N_HEAD, HEAD_DIM

    # ---- embedding gather folded in: one-hot matmul (exact, f32) ----
    ids = idx_ref[...]                                               # (T,1) i32
    vocab_iota = jax.lax.broadcasted_iota(jnp.int32, (T, VOCAB_SIZE), 1)
    tok_onehot = (ids == vocab_iota).astype(jnp.float32)             # (T, V)
    tok_emb = jnp.dot(tok_onehot, wte_ref[...],
                      preferred_element_type=jnp.float32)            # (T, C)
    pos_emb = wpe_ref[0:T, :]                                        # static slice
    x = tok_emb + pos_emb                                            # (T, C) f32

    # ---- causal mask: plain per-sequence triangle, hoisted over layers ----
    r = jax.lax.broadcasted_iota(jnp.int32, (T, T), 0)
    c = jax.lax.broadcasted_iota(jnp.int32, (T, T), 1)
    causal = r >= c
    scale = jnp.float32(1.0 / math.sqrt(D))

    for l in range(N_LAYERS):                # static unroll over layers
        ln12 = ln_ref[2 * l]                 # (2, C): [gamma, beta] of ln_1
        ln22 = ln_ref[2 * l + 1]             # (2, C): [gamma, beta] of ln2
        bsm = bsm_ref[l]                     # (5, C): [bq, bk, bv, bpr, bmlp]

        # ---------------- attention branch ----------------
        h = _ln(x, ln12[0:1], ln12[1:2])                             # (T, C) f32
        qkv = jnp.dot(h.astype(jnp.bfloat16), wqkv_ref[l],
                      preferred_element_type=jnp.float32)            # (T, 128)
        q = qkv[:, 0 * C:1 * C] + bsm[0:1]
        k = qkv[:, 1 * C:2 * C] + bsm[1:2]
        v = qkv[:, 2 * C:3 * C] + bsm[2:3]

        y_heads = []
        for hd in range(H):                  # per-head 2-D, no transposes
            qh = q[:, hd * D:(hd + 1) * D].astype(jnp.bfloat16)      # (T, D)
            kh = k[:, hd * D:(hd + 1) * D].astype(jnp.bfloat16)
            vh = v[:, hd * D:(hd + 1) * D].astype(jnp.bfloat16)
            att = jnp.einsum('td,sd->ts', qh, kh,
                             preferred_element_type=jnp.float32) * scale
            att = jnp.where(causal, att, -1e30)
            att = att - jnp.max(att, axis=-1, keepdims=True)
            p = jnp.exp(att)                                         # EUP, f32
            p = p * pl.reciprocal(jnp.sum(p, axis=-1, keepdims=True),
                                  approx=True)
            y_heads.append(jnp.dot(p.astype(jnp.bfloat16), vh,
                                   preferred_element_type=jnp.float32))
        y = jnp.concatenate(y_heads, axis=-1)                        # (T, C)
        y = jnp.dot(y.astype(jnp.bfloat16), wpr_ref[l],
                    preferred_element_type=jnp.float32) + bsm[3:4]
        x = x + y

        # ---------------- MLP branch ----------------
        h2 = _ln(x, ln22[0:1], ln22[1:2])
        h2 = jnp.dot(h2.astype(jnp.bfloat16), wfc_ref[l],
                     preferred_element_type=jnp.float32) + bfc_ref[l]
        h2 = _gelu_tanh(h2)
        h2 = jnp.dot(h2.astype(jnp.bfloat16), wmlp_ref[l],
                     preferred_element_type=jnp.float32) + bsm[4:5]
        x = x + h2

    # ---------------- final LN + tied lm_head (lane-dense padded output) ----
    lnf = ln_ref[2 * N_LAYERS]
    hf = _ln(x, lnf[0:1], lnf[1:2])
    o_ref[...] = jnp.dot(hf.astype(jnp.bfloat16), wlm_ref[...],
                         preferred_element_type=jnp.float32)         # (T, V_PAD)


# ---------------- pallas_call wrapper ----------------
PARAM_ORDER = ("wte", "wpe", "ln", "wqkv", "b_small", "wpr", "wfc", "wmlp",
               "bfc", "wlm")


def _full_spec(a):
    nd = a.ndim
    return pl.BlockSpec(a.shape, lambda b, _n=nd: (0,) * _n)


def gpt_fused_forward(idx, params):
    B, T = idx.shape
    # TODO(synk): ragged T not a multiple of 8 would need row padding for the
    # (8,128) BlockSpec constraint; the demo uses T=8.
    assert T % 8 == 0 and T <= BLOCK_SIZE
    idx2 = idx.reshape(B * T, 1).astype(jnp.int32)
    weights = [params[k] for k in PARAM_ORDER]

    return pl.pallas_call(
        _gpt_kernel,
        out_shape=jax.ShapeDtypeStruct((B * T, V_PAD), jnp.float32),
        grid=(B,),
        in_specs=[pl.BlockSpec((T, 1), lambda b: (b, 0))]
                 + [_full_spec(a) for a in weights],
        out_specs=pl.BlockSpec((T, V_PAD), lambda b: (b, 0)),
        compiler_params=pltpu.CompilerParams(
            dimension_semantics=("parallel",),      # both TCs on v7x
            vmem_limit_bytes=32 * 1024 * 1024),
    )(idx2, *weights)


# ---------------- parameter init (matches _init_weights, pre-laid-out) ------
def init_params(key):
    L, C = N_LAYERS, N_EMBED
    keys = list(jax.random.split(key, 2 + 4 * L))
    ki = iter(keys)
    proj_std = INIT_STD * (2 * L) ** (-0.5)   # NANOGPT_SCALE_INIT on c_proj

    wte = INIT_STD * jax.random.normal(next(ki), (VOCAB_SIZE, C), jnp.float32)
    wpe = INIT_STD * jax.random.normal(next(ki), (BLOCK_SIZE, C), jnp.float32)

    wqkv_l, wpr_l, wfc_l, wmlp_l = [], [], [], []
    for _ in range(L):
        # stored pre-transposed: (in_features, out_features)
        w_qkv = INIT_STD * jax.random.normal(next(ki), (C, 3 * C), jnp.float32)
        w_pr = proj_std * jax.random.normal(next(ki), (C, C), jnp.float32)
        w_fc = INIT_STD * jax.random.normal(next(ki), (C, 4 * C), jnp.float32)
        w_mlp = proj_std * jax.random.normal(next(ki), (4 * C, C), jnp.float32)
        # fused qkv, padded 96 -> 128 lanes host-side (lane-dense single matmul)
        wqkv_l.append(jnp.pad(w_qkv, ((0, 0), (0, QKV_PAD - 3 * C))))
        wpr_l.append(w_pr)
        wfc_l.append(w_fc)
        wmlp_l.append(w_mlp)

    stack_bf16 = lambda xs: jnp.stack(xs, axis=0).astype(jnp.bfloat16)

    # All LayerNorm params packed: rows 2l = ln_1(l), 2l+1 = ln2(l), 2L = ln_f.
    ln = jnp.stack([jnp.ones((2 * L + 1, C), jnp.float32),
                    jnp.zeros((2 * L + 1, C), jnp.float32)], axis=1)  # (2L+1,2,C)

    params = dict(
        wte=wte, wpe=wpe, ln=ln,
        wqkv=stack_bf16(wqkv_l),                       # (L, C, 128) bf16
        b_small=jnp.zeros((L, 5, C), jnp.float32),     # [bq,bk,bv,bpr,bmlp]
        wpr=stack_bf16(wpr_l),                         # (L, C, C)
        wfc=stack_bf16(wfc_l),                         # (L, C, 4C)
        wmlp=stack_bf16(wmlp_l),                       # (L, 4C, C)
        bfc=jnp.zeros((L, 1, 4 * C), jnp.float32),
        # lm_head weight tied to wte; padded to 128 lanes for unmasked stores.
        # (bf16 cast => tying is not bit-exact with the f32 embedding lookup.)
        wlm=jnp.pad(wte.T, ((0, 0), (0, V_PAD - VOCAB_SIZE))).astype(jnp.bfloat16),
    )
    return params


# ---------------- GPT forward ----------------
def gpt_forward(params, idx, targets=None):
    B, T = idx.shape
    assert T <= BLOCK_SIZE
    logits_pad = gpt_fused_forward(idx, params)          # (B*T, V_PAD)
    logits = logits_pad[:, :VOCAB_SIZE].reshape(B, T, VOCAB_SIZE)

    loss = None
    if targets is not None:
        # TODO(synk): cross-entropy stays as a small plain-JAX glue reduction.
        logp = jax.nn.log_softmax(logits.reshape(-1, VOCAB_SIZE), axis=-1)
        nll = -jnp.take_along_axis(logp, targets.reshape(-1, 1), axis=-1)
        loss = jnp.mean(nll)
    return logits, loss


if __name__ == "__main__":
    key = jax.random.PRNGKey(0)
    pkey, ikey, tkey = jax.random.split(key, 3)
    params = init_params(pkey)

    B, T = 2, 8
    idx = jax.random.randint(ikey, (B, T), 0, VOCAB_SIZE, dtype=jnp.int32)
    targets = jax.random.randint(tkey, (B, T), 0, VOCAB_SIZE, dtype=jnp.int32)

    logits, loss = gpt_forward(params, idx, targets)
    logits = jax.block_until_ready(logits)
    loss = jax.block_until_ready(loss)

    assert logits.shape == (B, T, VOCAB_SIZE)
    assert bool(jnp.all(jnp.isfinite(logits))) and bool(jnp.isfinite(loss))
    print("KERNEL_OK")
</pallas_src>

<mosaic_0001>
module attributes {stable_mosaic.version = 11 : i64} {
  func.func @_gpt_kernel(%arg0: i32, %arg1: memref<8x1xi32, #tpu.memory_space<vmem>>, %arg2: memref<64x32xf32, #tpu.memory_space<vmem>>, %arg3: memref<16x32xf32, #tpu.memory_space<vmem>>, %arg4: memref<5x2x32xf32, #tpu.memory_space<vmem>>, %arg5: memref<2x32x128xbf16, #tpu.memory_space<vmem>>, %arg6: memref<2x5x32xf32, #tpu.memory_space<vmem>>, %arg7: memref<2x32x32xbf16, #tpu.memory_space<vmem>>, %arg8: memref<2x32x128xbf16, #tpu.memory_space<vmem>>, %arg9: memref<2x128x32xbf16, #tpu.memory_space<vmem>>, %arg10: memref<2x1x128xf32, #tpu.memory_space<vmem>>, %arg11: memref<32x128xbf16, #tpu.memory_space<vmem>>, %arg12: memref<8x128xf32, #tpu.memory_space<vmem>>) attributes {dimension_semantics = [#tpu.dimension_semantics<parallel>], iteration_bounds = array<i64: 2>, scalar_prefetch = 0 : i64, scratch_operands = 0 : i64, tpu.core_type = #tpu.core_type<tc>, window_params = [{transform_indices = @transform_0, window_bounds = array<i64: 8, 1>}, {pipeline_mode = #tpu.pipeline_mode<synchronous>, transform_indices = @transform_1, window_bounds = array<i64: 64, 32>}, {pipeline_mode = #tpu.pipeline_mode<synchronous>, transform_indices = @transform_2, window_bounds = array<i64: 16, 32>}, {pipeline_mode = #tpu.pipeline_mode<synchronous>, transform_indices = @transform_3, window_bounds = array<i64: 5, 2, 32>}, {pipeline_mode = #tpu.pipeline_mode<synchronous>, transform_indices = @transform_4, window_bounds = array<i64: 2, 32, 128>}, {pipeline_mode = #tpu.pipeline_mode<synchronous>, transform_indices = @transform_5, window_bounds = array<i64: 2, 5, 32>}, {pipeline_mode = #tpu.pipeline_mode<synchronous>, transform_indices = @transform_6, window_bounds = array<i64: 2, 32, 32>}, {pipeline_mode = #tpu.pipeline_mode<synchronous>, transform_indices = @transform_7, window_bounds = array<i64: 2, 32, 128>}, {pipeline_mode = #tpu.pipeline_mode<synchronous>, transform_indices = @transform_8, window_bounds = array<i64: 2, 128, 32>}, {pipeline_mode = #tpu.pipeline_mode<synchronous>, transform_indices = @transform_9, window_bounds = array<i64: 2, 1, 128>}, {pipeline_mode = #tpu.pipeline_mode<synchronous>, transform_indices = @transform_10, window_bounds = array<i64: 32, 128>}, {transform_indices = @transform_11, window_bounds = array<i64: 8, 128>}]} {
    %c0 = arith.constant 0 : index
    %c0_0 = arith.constant 0 : index
    %0 = vector.load %arg1[%c0, %c0_0] : memref<8x1xi32, #tpu.memory_space<vmem>>, vector<8x1xi32>
    %1 = tpu.iota {dimensions = array<i32: 1>} : vector<8x64xi32>
    %2 = vector.broadcast %0 : vector<8x1xi32> to vector<8x64xi32>
    %3 = arith.cmpi eq, %2, %1 : vector<8x64xi32>
    %4 = arith.extui %3 : vector<8x64xi1> to vector<8x64xi32>
    %5 = arith.sitofp %4 : vector<8x64xi32> to vector<8x64xf32>
    %c0_1 = arith.constant 0 : index
    %c0_2 = arith.constant 0 : index
    %6 = vector.load %arg2[%c0_1, %c0_2] : memref<64x32xf32, #tpu.memory_space<vmem>>, vector<64x32xf32>
    %cst = arith.constant dense<0.000000e+00> : vector<8x32xf32>
    %7 = tpu.matmul %5, %6, %cst {dimension_numbers = #tpu.dot_dimension_numbers<[1], [0], [0], [1], [0, 0, 1, 1], [], []>} : vector<8x64xf32>, vector<64x32xf32>, vector<8x32xf32> -> vector<8x32xf32>
    %c0_3 = arith.constant 0 : index
    %c0_4 = arith.constant 0 : index
    %8 = vector.load %arg3[%c0_3, %c0_4] : memref<16x32xf32, #tpu.memory_space<vmem>>, vector<8x32xf32>
    %9 = arith.addf %7, %8 : vector<8x32xf32>
    %10 = tpu.iota {dimensions = array<i32: 0>} : vector<8x8xi32>
    %11 = tpu.iota {dimensions = array<i32: 1>} : vector<8x8xi32>
    %12 = arith.cmpi sge, %10, %11 : vector<8x8xi32>
    %c0_5 = arith.constant 0 : index
    %c0_6 = arith.constant 0 : index
    %c0_7 = arith.constant 0 : index
    %13 = vector.load %arg4[%c0_5, %c0_6, %c0_7] : memref<5x2x32xf32, #tpu.memory_space<vmem>>, vector<1x2x32xf32>
    %14 = vector.shape_cast %13 : vector<1x2x32xf32> to vector<2x32xf32>
    %c1 = arith.constant 1 : index
    %c0_8 = arith.constant 0 : index
    %c0_9 = arith.constant 0 : index
    %15 = vector.load %arg4[%c1, %c0_8, %c0_9] : memref<5x2x32xf32, #tpu.memory_space<vmem>>, vector<1x2x32xf32>
    %16 = vector.shape_cast %15 : vector<1x2x32xf32> to vector<2x32xf32>
    %c0_10 = arith.constant 0 : index
    %c0_11 = arith.constant 0 : index
    %c0_12 = arith.constant 0 : index
    %17 = vector.load %arg6[%c0_10, %c0_11, %c0_12] : memref<2x5x32xf32, #tpu.memory_space<vmem>>, vector<1x5x32xf32>
    %18 = vector.shape_cast %17 : vector<1x5x32xf32> to vector<5x32xf32>
    %19 = vector.extract_strided_slice %14 {offsets = [0, 0], sizes = [1, 32], strides = [1, 1]} : vector<2x32xf32> to vector<1x32xf32>
    %20 = vector.extract_strided_slice %14 {offsets = [1, 0], sizes = [1, 32], strides = [1, 1]} : vector<2x32xf32> to vector<1x32xf32>
    %cst_13 = arith.constant dense<0.000000e+00> : vector<8xf32>
    %21 = vector.multi_reduction <add>, %9, %cst_13 [1] : vector<8x32xf32> to vector<8xf32>
    %22 = vector.shape_cast %21 : vector<8xf32> to vector<8x1xf32>
    %cst_14 = arith.constant 3.200000e+01 : f32
    %23 = vector.broadcast %cst_14 : f32 to vector<8x1xf32>
    %24 = arith.divf %22, %23 : vector<8x1xf32>
    %25 = vector.broadcast %24 : vector<8x1xf32> to vector<8x32xf32>
    %26 = arith.subf %9, %25 : vector<8x32xf32>
    %27 = arith.mulf %26, %26 : vector<8x32xf32>
    %cst_15 = arith.constant dense<0.000000e+00> : vector<8xf32>
    %28 = vector.multi_reduction <add>, %27, %cst_15 [1] : vector<8x32xf32> to vector<8xf32>
    %29 = vector.shape_cast %28 : vector<8xf32> to vector<8x1xf32>
    %cst_16 = arith.constant 3.200000e+01 : f32
    %30 = vector.broadcast %cst_16 : f32 to vector<8x1xf32>
    %31 = arith.divf %29, %30 : vector<8x1xf32>
    %cst_17 = arith.constant 9.99999974E-6 : f32
    %32 = vector.broadcast %cst_17 : f32 to vector<8x1xf32>
    %33 = arith.addf %31, %32 : vector<8x1xf32>
    %34 = math.rsqrt %33 : vector<8x1xf32>
    %35 = vector.broadcast %34 : vector<8x1xf32> to vector<8x32xf32>
    %36 = arith.mulf %26, %35 : vector<8x32xf32>
    %37 = vector.broadcast %19 : vector<1x32xf32> to vector<8x32xf32>
    %38 = arith.mulf %36, %37 : vector<8x32xf32>
    %39 = vector.broadcast %20 : vector<1x32xf32> to vector<8x32xf32>
    %40 = arith.addf %38, %39 : vector<8x32xf32>
    %41 = arith.truncf %40 : vector<8x32xf32> to vector<8x32xbf16>
    %c0_18 = arith.constant 0 : index
    %c0_19 = arith.constant 0 : index
    %c0_20 = arith.constant 0 : index
    %42 = vector.load %arg5[%c0_18, %c0_19, %c0_20] : memref<2x32x128xbf16, #tpu.memory_space<vmem>>, vector<1x32x128xbf16>
    %43 = vector.shape_cast %42 : vector<1x32x128xbf16> to vector<32x128xbf16>
    %cst_21 = arith.constant dense<0.000000e+00> : vector<8x128xf32>
    %44 = tpu.matmul %41, %43, %cst_21 {dimension_numbers = #tpu.dot_dimension_numbers<[1], [0], [0], [1], [0, 0, 1, 1], [], []>} : vector<8x32xbf16>, vector<32x128xbf16>, vector<8x128xf32> -> vector<8x128xf32>
    %45 = vector.extract_strided_slice %44 {offsets = [0, 0], sizes = [8, 32], strides = [1, 1]} : vector<8x128xf32> to vector<8x32xf32>
    %46 = vector.extract_strided_slice %18 {offsets = [0, 0], sizes = [1, 32], strides = [1, 1]} : vector<5x32xf32> to vector<1x32xf32>
    %47 = vector.broadcast %46 : vector<1x32xf32> to vector<8x32xf32>
    %48 = arith.addf %45, %47 : vector<8x32xf32>
    %49 = vector.extract_strided_slice %44 {offsets = [0, 32], sizes = [8, 32], strides = [1, 1]} : vector<8x128xf32> to vector<8x32xf32>
    %50 = vector.extract_strided_slice %18 {offsets = [1, 0], sizes = [1, 32], strides = [1, 1]} : vector<5x32xf32> to vector<1x32xf32>
    %51 = vector.broadcast %50 : vector<1x32xf32> to vector<8x32xf32>
    %52 = arith.addf %49, %51 : vector<8x32xf32>
    %53 = vector.extract_strided_slice %44 {offsets = [0, 64], sizes = [8, 32], strides = [1, 1]} : vector<8x128xf32> to vector<8x32xf32>
    %54 = vector.extract_strided_slice %18 {offsets = [2, 0], sizes = [1, 32], strides = [1, 1]} : vector<5x32xf32> to vector<1x32xf32>
    %55 = vector.broadcast %54 : vector<1x32xf32> to vector<8x32xf32>
    %56 = arith.addf %53, %55 : vector<8x32xf32>
    %57 = vector.extract_strided_slice %48 {offsets = [0, 0], sizes = [8, 8], strides = [1, 1]} : vector<8x32xf32> to vector<8x8xf32>
    %58 = arith.truncf %57 : vector<8x8xf32> to vector<8x8xbf16>
    %59 = vector.extract_strided_slice %52 {offsets = [0, 0], sizes = [8, 8], strides = [1, 1]} : vector<8x32xf32> to vector<8x8xf32>
    %60 = arith.truncf %59 : vector<8x8xf32> to vector<8x8xbf16>
    %61 = vector.extract_strided_slice %56 {offsets = [0, 0], sizes = [8, 8], strides = [1, 1]} : vector<8x32xf32> to vector<8x8xf32>
    %62 = arith.truncf %61 : vector<8x8xf32> to vector<8x8xbf16>
    "tpu.trace_start"() <{level = 10 : i32, message = "td,sd->ts"}> : () -> ()
    %cst_22 = arith.constant dense<0.000000e+00> : vector<8x8xf32>
    %63 = tpu.matmul %58, %60, %cst_22 {dimension_numbers = #tpu.dot_dimension_numbers<[1], [1], [0], [0], [0, 0, 1, 0], [], []>} : vector<8x8xbf16>, vector<8x8xbf16>, vector<8x8xf32> -> vector<8x8xf32>
    "tpu.trace_stop"() : () -> ()
    %cst_23 = arith.constant 0.353553385 : f32
    %64 = vector.broadcast %cst_23 : f32 to vector<8x8xf32>
    %65 = arith.mulf %63, %64 : vector<8x8xf32>
    %cst_24 = arith.constant -1.000000e+30 : f32
    %66 = vector.broadcast %cst_24 : f32 to vector<8x8xf32>
    %67 = arith.select %12, %65, %66 : vector<8x8xi1>, vector<8x8xf32>
    %cst_25 = arith.constant dense<0xFF800000> : vector<8xf32>
    %68 = vector.multi_reduction <maximumf>, %67, %cst_25 [1] : vector<8x8xf32> to vector<8xf32>
    %69 = vector.shape_cast %68 : vector<8xf32> to vector<8x1xf32>
    %70 = vector.broadcast %69 : vector<8x1xf32> to vector<8x8xf32>
    %71 = arith.subf %67, %70 : vector<8x8xf32>
    %72 = math.exp %71 : vector<8x8xf32>
    %cst_26 = arith.constant dense<0.000000e+00> : vector<8xf32>
    %73 = vector.multi_reduction <add>, %72, %cst_26 [1] : vector<8x8xf32> to vector<8xf32>
    %74 = vector.shape_cast %73 : vector<8xf32> to vector<8x1xf32>
    %75 = tpu.reciprocal %74 {approx = true} : vector<8x1xf32> -> vector<8x1xf32>
    %76 = vector.broadcast %75 : vector<8x1xf32> to vector<8x8xf32>
    %77 = arith.mulf %72, %76 : vector<8x8xf32>
    %78 = arith.truncf %77 : vector<8x8xf32> to vector<8x8xbf16>
    %cst_27 = arith.constant dense<0.000000e+00> : vector<8x8xf32>
    %79 = tpu.matmul %78, %62, %cst_27 {dimension_numbers = #tpu.dot_dimension_numbers<[1], [0], [0], [1], [0, 0, 1, 1], [], []>} : vector<8x8xbf16>, vector<8x8xbf16>, vector<8x8xf32> -> vector<8x8xf32>
    %80 = vector.extract_strided_slice %48 {offsets = [0, 8], sizes = [8, 8], strides = [1, 1]} : vector<8x32xf32> to vector<8x8xf32>
    %81 = arith.truncf %80 : vector<8x8xf32> to vector<8x8xbf16>
    %82 = vector.extract_strided_slice %52 {offsets = [0, 8], sizes = [8, 8], strides = [1, 1]} : vector<8x32xf32> to vector<8x8xf32>
    %83 = arith.truncf %82 : vector<8x8xf32> to vector<8x8xbf16>
    %84 = vector.extract_strided_slice %56 {offsets = [0, 8], sizes = [8, 8], strides = [1, 1]} : vector<8x32xf32> to vector<8x8xf32>
    %85 = arith.truncf %84 : vector<8x8xf32> to vector<8x8xbf16>
    "tpu.trace_start"() <{level = 10 : i32, message = "td,sd->ts"}> : () -> ()
    %cst_28 = arith.constant dense<0.000000e+00> : vector<8x8xf32>
    %86 = tpu.matmul %81, %83, %cst_28 {dimension_numbers = #tpu.dot_dimension_numbers<[1], [1], [0], [0], [0, 0, 1, 0], [], []>} : vector<8x8xbf16>, vector<8x8xbf16>, vector<8x8xf32> -> vector<8x8xf32>
    "tpu.trace_stop"() : () -> ()
    %cst_29 = arith.constant 0.353553385 : f32
    %87 = vector.broadcast %cst_29 : f32 to vector<8x8xf32>
    %88 = arith.mulf %86, %87 : vector<8x8xf32>
    %cst_30 = arith.constant -1.000000e+30 : f32
    %89 = vector.broadcast %cst_30 : f32 to vector<8x8xf32>
    %90 = arith.select %12, %88, %89 : vector<8x8xi1>, vector<8x8xf32>
    %cst_31 = arith.constant dense<0xFF800000> : vector<8xf32>
    %91 = vector.multi_reduction <maximumf>, %90, %cst_31 [1] : vector<8x8xf32> to vector<8xf32>
    %92 = vector.shape_cast %91 : vector<8xf32> to vector<8x1xf32>
    %93 = vector.broadcast %92 : vector<8x1xf32> to vector<8x8xf32>
    %94 = arith.subf %90, %93 : vector<8x8xf32>
    %95 = math.exp %94 : vector<8x8xf32>
    %cst_32 = arith.constant dense<0.000000e+00> : vector<8xf32>
    %96 = vector.multi_reduction <add>, %95, %cst_32 [1] : vector<8x8xf32> to vector<8xf32>
    %97 = vector.shape_cast %96 : vector<8xf32> to vector<8x1xf32>
    %98 = tpu.reciprocal %97 {approx = true} : vector<8x1xf32> -> vector<8x1xf32>
    %99 = vector.broadcast %98 : vector<8x1xf32> to vector<8x8xf32>
    %100 = arith.mulf %95, %99 : vector<8x8xf32>
    %101 = arith.truncf %100 : vector<8x8xf32> to vector<8x8xbf16>
    %cst_33 = arith.constant dense<0.000000e+00> : vector<8x8xf32>
    %102 = tpu.matmul %101, %85, %cst_33 {dimension_numbers = #tpu.dot_dimension_numbers<[1], [0], [0], [1], [0, 0, 1, 1], [], []>} : vector<8x8xbf16>, vector<8x8xbf16>, vector<8x8xf32> -> vector<8x8xf32>
    %103 = vector.extract_strided_slice %48 {offsets = [0, 16], sizes = [8, 8], strides = [1, 1]} : vector<8x32xf32> to vector<8x8xf32>
    %104 = arith.truncf %103 : vector<8x8xf32> to vector<8x8xbf16>
    %105 = vector.extract_strided_slice %52 {offsets = [0, 16], sizes = [8, 8], strides = [1, 1]} : vector<8x32xf32> to vector<8x8xf32>
    %106 = arith.truncf %105 : vector<8x8xf32> to vector<8x8xbf16>
    %107 = vector.extract_strided_slice %56 {offsets = [0, 16], sizes = [8, 8], strides = [1, 1]} : vector<8x32xf32> to vector<8x8xf32>
    %108 = arith.truncf %107 : vector<8x8xf32> to vector<8x8xbf16>
    "tpu.trace_start"() <{level = 10 : i32, message = "td,sd->ts"}> : () -> ()
    %cst_34 = arith.constant dense<0.000000e+00> : vector<8x8xf32>
    %109 = tpu.matmul %104, %106, %cst_34 {dimension_numbers = #tpu.dot_dimension_numbers<[1], [1], [0], [0], [0, 0, 1, 0], [], []>} : vector<8x8xbf16>, vector<8x8xbf16>, vector<8x8xf32> -> vector<8x8xf32>
    "tpu.trace_stop"() : () -> ()
    %cst_35 = arith.constant 0.353553385 : f32
    %110 = vector.broadcast %cst_35 : f32 to vector<8x8xf32>
    %111 = arith.mulf %109, %110 : vector<8x8xf32>
    %cst_36 = arith.constant -1.000000e+30 : f32
    %112 = vector.broadcast %cst_36 : f32 to vector<8x8xf32>
    %113 = arith.select %12, %111, %112 : vector<8x8xi1>, vector<8x8xf32>
    %cst_37 = arith.constant dense<0xFF800000> : vector<8xf32>
    %114 = vector.multi_reduction <maximumf>, %113, %cst_37 [1] : vector<8x8xf32> to vector<8xf32>
    %115 = vector.shape_cast %114 : vector<8xf32> to vector<8x1xf32>
    %116 = vector.broadcast %115 : vector<8x1xf32> to vector<8x8xf32>
    %117 = arith.subf %113, %116 : vector<8x8xf32>
    %118 = math.exp %117 : vector<8x8xf32>
    %cst_38 = arith.constant dense<0.000000e+00> : vector<8xf32>
    %119 = vector.multi_reduction <add>, %118, %cst_38 [1] : vector<8x8xf32> to vector<8xf32>
    %120 = vector.shape_cast %119 : vector<8xf32> to vector<8x1xf32>
    %121 = tpu.reciprocal %120 {approx = true} : vector<8x1xf32> -> vector<8x1xf32>
    %122 = vector.broadcast %121 : vector<8x1xf32> to vector<8x8xf32>
    %123 = arith.mulf %118, %122 : vector<8x8xf32>
    %124 = arith.truncf %123 : vector<8x8xf32> to vector<8x8xbf16>
    %cst_39 = arith.constant dense<0.000000e+00> : vector<8x8xf32>
    %125 = tpu.matmul %124, %108, %cst_39 {dimension_numbers = #tpu.dot_dimension_numbers<[1], [0], [0], [1], [0, 0, 1, 1], [], []>} : vector<8x8xbf16>, vector<8x8xbf16>, vector<8x8xf32> -> vector<8x8xf32>
    %126 = vector.extract_strided_slice %48 {offsets = [0, 24], sizes = [8, 8], strides = [1, 1]} : vector<8x32xf32> to vector<8x8xf32>
    %127 = arith.truncf %126 : vector<8x8xf32> to vector<8x8xbf16>
    %128 = vector.extract_strided_slice %52 {offsets = [0, 24], sizes = [8, 8], strides = [1, 1]} : vector<8x32xf32> to vector<8x8xf32>
    %129 = arith.truncf %128 : vector<8x8xf32> to vector<8x8xbf16>
    %130 = vector.extract_strided_slice %56 {offsets = [0, 24], sizes = [8, 8], strides = [1, 1]} : vector<8x32xf32> to vector<8x8xf32>
    %131 = arith.truncf %130 : vector<8x8xf32> to vector<8x8xbf16>
    "tpu.trace_start"() <{level = 10 : i32, message = "td,sd->ts"}> : () -> ()
    %cst_40 = arith.constant dense<0.000000e+00> : vector<8x8xf32>
    %132 = tpu.matmul %127, %129, %cst_40 {dimension_numbers = #tpu.dot_dimension_numbers<[1], [1], [0], [0], [0, 0, 1, 0], [], []>} : vector<8x8xbf16>, vector<8x8xbf16>, vector<8x8xf32> -> vector<8x8xf32>
    "tpu.trace_stop"() : () -> ()
    %cst_41 = arith.constant 0.353553385 : f32
    %133 = vector.broadcast %cst_41 : f32 to vector<8x8xf32>
    %134 = arith.mulf %132, %133 : vector<8x8xf32>
    %cst_42 = arith.constant -1.000000e+30 : f32
    %135 = vector.broadcast %cst_42 : f32 to vector<8x8xf32>
    %136 = arith.select %12, %134, %135 : vector<8x8xi1>, vector<8x8xf32>
    %cst_43 = arith.constant dense<0xFF800000> : vector<8xf32>
    %137 = vector.multi_reduction <maximumf>, %136, %cst_43 [1] : vector<8x8xf32> to vector<8xf32>
    %138 = vector.shape_cast %137 : vector<8xf32> to vector<8x1xf32>
    %139 = vector.broadcast %138 : vector<8x1xf32> to vector<8x8xf32>
    %140 = arith.subf %136, %139 : vector<8x8xf32>
    %141 = math.exp %140 : vector<8x8xf32>
    %cst_44 = arith.constant dense<0.000000e+00> : vector<8xf32>
    %142 = vector.multi_reduction <add>, %141, %cst_44 [1] : vector<8x8xf32> to vector<8xf32>
    %143 = vector.shape_cast %142 : vector<8xf32> to vector<8x1xf32>
    %144 = tpu.reciprocal %143 {approx = true} : vector<8x1xf32> -> vector<8x1xf32>
    %145 = vector.broadcast %144 : vector<8x1xf32> to vector<8x8xf32>
    %146 = arith.mulf %141, %145 : vector<8x8xf32>
    %147 = arith.truncf %146 : vector<8x8xf32> to vector<8x8xbf16>
    %cst_45 = arith.constant dense<0.000000e+00> : vector<8x8xf32>
    %148 = tpu.matmul %147, %131, %cst_45 {dimension_numbers = #tpu.dot_dimension_numbers<[1], [0], [0], [1], [0, 0, 1, 1], [], []>} : vector<8x8xbf16>, vector<8x8xbf16>, vector<8x8xf32> -> vector<8x8xf32>
    %149 = tpu.concatenate %79, %102, %125, %148 in 1 : vector<8x8xf32>, vector<8x8xf32>, vector<8x8xf32>, vector<8x8xf32> -> vector<8x32xf32>
    %150 = arith.truncf %149 : vector<8x32xf32> to vector<8x32xbf16>
    %c0_46 = arith.constant 0 : index
    %c0_47 = arith.constant 0 : index
    %c0_48 = arith.constant 0 : index
    %151 = vector.load %arg7[%c0_46, %c0_47, %c0_48] : memref<2x32x32xbf16, #tpu.memory_space<vmem>>, vector<1x32x32xbf16>
    %152 = vector.shape_cast %151 : vector<1x32x32xbf16> to vector<32x32xbf16>
    %cst_49 = arith.constant dense<0.000000e+00> : vector<8x32xf32>
    %153 = tpu.matmul %150, %152, %cst_49 {dimension_numbers = #tpu.dot_dimension_numbers<[1], [0], [0], [1], [0, 0, 1, 1], [], []>} : vector<8x32xbf16>, vector<32x32xbf16>, vector<8x32xf32> -> vector<8x32xf32>
    %154 = vector.extract_strided_slice %18 {offsets = [3, 0], sizes = [1, 32], strides = [1, 1]} : vector<5x32xf32> to vector<1x32xf32>
    %155 = vector.broadcast %154 : vector<1x32xf32> to vector<8x32xf32>
    %156 = arith.addf %153, %155 : vector<8x32xf32>
    %157 = arith.addf %9, %156 : vector<8x32xf32>
    %158 = vector.extract_strided_slice %16 {offsets = [0, 0], sizes = [1, 32], strides = [1, 1]} : vector<2x32xf32> to vector<1x32xf32>
    %159 = vector.extract_strided_slice %16 {offsets = [1, 0], sizes = [1, 32], strides = [1, 1]} : vector<2x32xf32> to vector<1x32xf32>
    %cst_50 = arith.constant dense<0.000000e+00> : vector<8xf32>
    %160 = vector.multi_reduction <add>, %157, %cst_50 [1] : vector<8x32xf32> to vector<8xf32>
    %161 = vector.shape_cast %160 : vector<8xf32> to vector<8x1xf32>
    %cst_51 = arith.constant 3.200000e+01 : f32
    %162 = vector.broadcast %cst_51 : f32 to vector<8x1xf32>
    %163 = arith.divf %161, %162 : vector<8x1xf32>
    %164 = vector.broadcast %163 : vector<8x1xf32> to vector<8x32xf32>
    %165 = arith.subf %157, %164 : vector<8x32xf32>
    %166 = arith.mulf %165, %165 : vector<8x32xf32>
    %cst_52 = arith.constant dense<0.000000e+00> : vector<8xf32>
    %167 = vector.multi_reduction <add>, %166, %cst_52 [1] : vector<8x32xf32> to vector<8xf32>
    %168 = vector.shape_cast %167 : vector<8xf32> to vector<8x1xf32>
    %cst_53 = arith.constant 3.200000e+01 : f32
    %169 = vector.broadcast %cst_53 : f32 to vector<8x1xf32>
    %170 = arith.divf %168, %169 : vector<8x1xf32>
    %cst_54 = arith.constant 9.99999974E-6 : f32
    %171 = vector.broadcast %cst_54 : f32 to vector<8x1xf32>
    %172 = arith.addf %170, %171 : vector<8x1xf32>
    %173 = math.rsqrt %172 : vector<8x1xf32>
    %174 = vector.broadcast %173 : vector<8x1xf32> to vector<8x32xf32>
    %175 = arith.mulf %165, %174 : vector<8x32xf32>
    %176 = vector.broadcast %158 : vector<1x32xf32> to vector<8x32xf32>
    %177 = arith.mulf %175, %176 : vector<8x32xf32>
    %178 = vector.broadcast %159 : vector<1x32xf32> to vector<8x32xf32>
    %179 = arith.addf %177, %178 : vector<8x32xf32>
    %180 = arith.truncf %179 : vector<8x32xf32> to vector<8x32xbf16>
    %c0_55 = arith.constant 0 : index
    %c0_56 = arith.constant 0 : index
    %c0_57 = arith.constant 0 : index
    %181 = vector.load %arg8[%c0_55, %c0_56, %c0_57] : memref<2x32x128xbf16, #tpu.memory_space<vmem>>, vector<1x32x128xbf16>
    %182 = vector.shape_cast %181 : vector<1x32x128xbf16> to vector<32x128xbf16>
    %cst_58 = arith.constant dense<0.000000e+00> : vector<8x128xf32>
    %183 = tpu.matmul %180, %182, %cst_58 {dimension_numbers = #tpu.dot_dimension_numbers<[1], [0], [0], [1], [0, 0, 1, 1], [], []>} : vector<8x32xbf16>, vector<32x128xbf16>, vector<8x128xf32> -> vector<8x128xf32>
    %c0_59 = arith.constant 0 : index
    %c0_60 = arith.constant 0 : index
    %c0_61 = arith.constant 0 : index
    %184 = vector.load %arg10[%c0_59, %c0_60, %c0_61] : memref<2x1x128xf32, #tpu.memory_space<vmem>>, vector<1x1x128xf32>
    %185 = vector.shape_cast %184 : vector<1x1x128xf32> to vector<1x128xf32>
    %186 = vector.broadcast %185 : vector<1x128xf32> to vector<8x128xf32>
    %187 = arith.addf %183, %186 : vector<8x128xf32>
    %cst_62 = arith.constant 5.000000e-01 : f32
    %188 = vector.broadcast %cst_62 : f32 to vector<8x128xf32>
    %189 = arith.mulf %188, %187 : vector<8x128xf32>
    %cst_63 = arith.constant 4.471500e-02 : f32
    %190 = vector.broadcast %cst_63 : f32 to vector<8x128xf32>
    %191 = arith.mulf %190, %187 : vector<8x128xf32>
    %192 = arith.mulf %191, %187 : vector<8x128xf32>
    %193 = arith.mulf %192, %187 : vector<8x128xf32>
    %194 = arith.addf %187, %193 : vector<8x128xf32>
    %cst_64 = arith.constant 0.797884583 : f32
    %195 = vector.broadcast %cst_64 : f32 to vector<8x128xf32>
    %196 = arith.mulf %195, %194 : vector<8x128xf32>
    %197 = math.tanh %196 : vector<8x128xf32>
    %cst_65 = arith.constant 1.000000e+00 : f32
    %198 = vector.broadcast %cst_65 : f32 to vector<8x128xf32>
    %199 = arith.addf %198, %197 : vector<8x128xf32>
    %200 = arith.mulf %189, %199 : vector<8x128xf32>
    %201 = arith.truncf %200 : vector<8x128xf32> to vector<8x128xbf16>
    %c0_66 = arith.constant 0 : index
    %c0_67 = arith.constant 0 : index
    %c0_68 = arith.constant 0 : index
    %202 = vector.load %arg9[%c0_66, %c0_67, %c0_68] : memref<2x128x32xbf16, #tpu.memory_space<vmem>>, vector<1x128x32xbf16>
    %203 = vector.shape_cast %202 : vector<1x128x32xbf16> to vector<128x32xbf16>
    %cst_69 = arith.constant dense<0.000000e+00> : vector<8x32xf32>
    %204 = tpu.matmul %201, %203, %cst_69 {dimension_numbers = #tpu.dot_dimension_numbers<[1], [0], [0], [1], [0, 0, 1, 1], [], []>} : vector<8x128xbf16>, vector<128x32xbf16>, vector<8x32xf32> -> vector<8x32xf32>
    %205 = vector.extract_strided_slice %18 {offsets = [4, 0], sizes = [1, 32], strides = [1, 1]} : vector<5x32xf32> to vector<1x32xf32>
    %206 = vector.broadcast %205 : vector<1x32xf32> to vector<8x32xf32>
    %207 = arith.addf %204, %206 : vector<8x32xf32>
    %208 = arith.addf %157, %207 : vector<8x32xf32>
    %c2 = arith.constant 2 : index
    %c0_70 = arith.constant 0 : index
    %c0_71 = arith.constant 0 : index
    %209 = vector.load %arg4[%c2, %c0_70, %c0_71] : memref<5x2x32xf32, #tpu.memory_space<vmem>>, vector<1x2x32xf32>
    %210 = vector.shape_cast %209 : vector<1x2x32xf32> to vector<2x32xf32>
    %c3 = arith.constant 3 : index
    %c0_72 = arith.constant 0 : index
    %c0_73 = arith.constant 0 : index
    %211 = vector.load %arg4[%c3, %c0_72, %c0_73] : memref<5x2x32xf32, #tpu.memory_space<vmem>>, vector<1x2x32xf32>
    %212 = vector.shape_cast %211 : vector<1x2x32xf32> to vector<2x32xf32>
    %c1_74 = arith.constant 1 : index
    %c0_75 = arith.constant 0 : index
    %c0_76 = arith.constant 0 : index
    %213 = vector.load %arg6[%c1_74, %c0_75, %c0_76] : memref<2x5x32xf32, #tpu.memory_space<vmem>>, vector<1x5x32xf32>
    %214 = vector.shape_cast %213 : vector<1x5x32xf32> to vector<5x32xf32>
    %215 = vector.extract_strided_slice %210 {offsets = [0, 0], sizes = [1, 32], strides = [1, 1]} : vector<2x32xf32> to vector<1x32xf32>
    %216 = vector.extract_strided_slice %210 {offsets = [1, 0], sizes = [1, 32], strides = [1, 1]} : vector<2x32xf32> to vector<1x32xf32>
    %cst_77 = arith.constant dense<0.000000e+00> : vector<8xf32>
    %217 = vector.multi_reduction <add>, %208, %cst_77 [1] : vector<8x32xf32> to vector<8xf32>
    %218 = vector.shape_cast %217 : vector<8xf32> to vector<8x1xf32>
    %cst_78 = arith.constant 3.200000e+01 : f32
    %219 = vector.broadcast %cst_78 : f32 to vector<8x1xf32>
    %220 = arith.divf %218, %219 : vector<8x1xf32>
    %221 = vector.broadcast %220 : vector<8x1xf32> to vector<8x32xf32>
    %222 = arith.subf %208, %221 : vector<8x32xf32>
    %223 = arith.mulf %222, %222 : vector<8x32xf32>
    %cst_79 = arith.constant dense<0.000000e+00> : vector<8xf32>
    %224 = vector.multi_reduction <add>, %223, %cst_79 [1] : vector<8x32xf32> to vector<8xf32>
    %225 = vector.shape_cast %224 : vector<8xf32> to vector<8x1xf32>
    %cst_80 = arith.constant 3.200000e+01 : f32
    %226 = vector.broadcast %cst_80 : f32 to vector<8x1xf32>
    %227 = arith.divf %225, %226 : vector<8x1xf32>
    %cst_81 = arith.constant 9.99999974E-6 : f32
    %228 = vector.broadcast %cst_81 : f32 to vector<8x1xf32>
    %229 = arith.addf %227, %228 : vector<8x1xf32>
    %230 = math.rsqrt %229 : vector<8x1xf32>
    %231 = vector.broadcast %230 : vector<8x1xf32> to vector<8x32xf32>
    %232 = arith.mulf %222, %231 : vector<8x32xf32>
    %233 = vector.broadcast %215 : vector<1x32xf32> to vector<8x32xf32>
    %234 = arith.mulf %232, %233 : vector<8x32xf32>
    %235 = vector.broadcast %216 : vector<1x32xf32> to vector<8x32xf32>
    %236 = arith.addf %234, %235 : vector<8x32xf32>
    %237 = arith.truncf %236 : vector<8x32xf32> to vector<8x32xbf16>
    %c1_82 = arith.constant 1 : index
    %c0_83 = arith.constant 0 : index
    %c0_84 = arith.constant 0 : index
    %238 = vector.load %arg5[%c1_82, %c0_83, %c0_84] : memref<2x32x128xbf16, #tpu.memory_space<vmem>>, vector<1x32x128xbf16>
    %239 = vector.shape_cast %238 : vector<1x32x128xbf16> to vector<32x128xbf16>
    %cst_85 = arith.constant dense<0.000000e+00> : vector<8x128xf32>
    %240 = tpu.matmul %237, %239, %cst_85 {dimension_numbers = #tpu.dot_dimension_numbers<[1], [0], [0], [1], [0, 0, 1, 1], [], []>} : vector<8x32xbf16>, vector<32x128xbf16>, vector<8x128xf32> -> vector<8x128xf32>
    %241 = vector.extract_strided_slice %240 {offsets = [0, 0], sizes = [8, 32], strides = [1, 1]} : vector<8x128xf32> to vector<8x32xf32>
    %242 = vector.extract_strided_slice %214 {offsets = [0, 0], sizes = [1, 32], strides = [1, 1]} : vector<5x32xf32> to vector<1x32xf32>
    %243 = vector.broadcast %242 : vector<1x32xf32> to vector<8x32xf32>
    %244 = arith.addf %241, %243 : vector<8x32xf32>
    %245 = vector.extract_strided_slice %240 {offsets = [0, 32], sizes = [8, 32], strides = [1, 1]} : vector<8x128xf32> to vector<8x32xf32>
    %246 = vector.extract_strided_slice %214 {offsets = [1, 0], sizes = [1, 32], strides = [1, 1]} : vector<5x32xf32> to vector<1x32xf32>
    %247 = vector.broadcast %246 : vector<1x32xf32> to vector<8x32xf32>
    %248 = arith.addf %245, %247 : vector<8x32xf32>
    %249 = vector.extract_strided_slice %240 {offsets = [0, 64], sizes = [8, 32], strides = [1, 1]} : vector<8x128xf32> to vector<8x32xf32>
    %250 = vector.extract_strided_slice %214 {offsets = [2, 0], sizes = [1, 32], strides = [1, 1]} : vector<5x32xf32> to vector<1x32xf32>
    %251 = vector.broadcast %250 : vector<1x32xf32> to vector<8x32xf32>
    %252 = arith.addf %249, %251 : vector<8x32xf32>
    %253 = vector.extract_strided_slice %244 {offsets = [0, 0], sizes = [8, 8], strides = [1, 1]} : vector<8x32xf32> to vector<8x8xf32>
    %254 = arith.truncf %253 : vector<8x8xf32> to vector<8x8xbf16>
    %255 = vector.extract_strided_slice %248 {offsets = [0, 0], sizes = [8, 8], strides = [1, 1]} : vector<8x32xf32> to vector<8x8xf32>
    %256 = arith.truncf %255 : vector<8x8xf32> to vector<8x8xbf16>
    %257 = vector.extract_strided_slice %252 {offsets = [0, 0], sizes = [8, 8], strides = [1, 1]} : vector<8x32xf32> to vector<8x8xf32>
    %258 = arith.truncf %257 : vector<8x8xf32> to vector<8x8xbf16>
    "tpu.trace_start"() <{level = 10 : i32, message = "td,sd->ts"}> : () -> ()
    %cst_86 = arith.constant dense<0.000000e+00> : vector<8x8xf32>
    %259 = tpu.matmul %254, %256, %cst_86 {dimension_numbers = #tpu.dot_dimension_numbers<[1], [1], [0], [0], [0, 0, 1, 0], [], []>} : vector<8x8xbf16>, vector<8x8xbf16>, vector<8x8xf32> -> vector<8x8xf32>
    "tpu.trace_stop"() : () -> ()
    %cst_87 = arith.constant 0.353553385 : f32
    %260 = vector.broadcast %cst_87 : f32 to vector<8x8xf32>
    %261 = arith.mulf %259, %260 : vector<8x8xf32>
    %cst_88 = arith.constant -1.000000e+30 : f32
    %262 = vector.broadcast %cst_88 : f32 to vector<8x8xf32>
    %263 = arith.select %12, %261, %262 : vector<8x8xi1>, vector<8x8xf32>
    %cst_89 = arith.constant dense<0xFF800000> : vector<8xf32>
    %264 = vector.multi_reduction <maximumf>, %263, %cst_89 [1] : vector<8x8xf32> to vector<8xf32>
    %265 = vector.shape_cast %264 : vector<8xf32> to vector<8x1xf32>
    %266 = vector.broadcast %265 : vector<8x1xf32> to vector<8x8xf32>
    %267 = arith.subf %263, %266 : vector<8x8xf32>
    %268 = math.exp %267 : vector<8x8xf32>
    %cst_90 = arith.constant dense<0.000000e+00> : vector<8xf32>
    %269 = vector.multi_reduction <add>, %268, %cst_90 [1] : vector<8x8xf32> to vector<8xf32>
    %270 = vector.shape_cast %269 : vector<8xf32> to vector<8x1xf32>
    %271 = tpu.reciprocal %270 {approx = true} : vector<8x1xf32> -> vector<8x1xf32>
    %272 = vector.broadcast %271 : vector<8x1xf32> to vector<8x8xf32>
    %273 = arith.mulf %268, %272 : vector<8x8xf32>
    %274 = arith.truncf %273 : vector<8x8xf32> to vector<8x8xbf16>
    %cst_91 = arith.constant dense<0.000000e+00> : vector<8x8xf32>
    %275 = tpu.matmul %274, %258, %cst_91 {dimension_numbers = #tpu.dot_dimension_numbers<[1], [0], [0], [1], [0, 0, 1, 1], [], []>} : vector<8x8xbf16>, vector<8x8xbf16>, vector<8x8xf32> -> vector<8x8xf32>
    %276 = vector.extract_strided_slice %244 {offsets = [0, 8], sizes = [8, 8], strides = [1, 1]} : vector<8x32xf32> to vector<8x8xf32>
    %277 = arith.truncf %276 : vector<8x8xf32> to vector<8x8xbf16>
    %278 = vector.extract_strided_slice %248 {offsets = [0, 8], sizes = [8, 8], strides = [1, 1]} : vector<8x32xf32> to vector<8x8xf32>
    %279 = arith.truncf %278 : vector<8x8xf32> to vector<8x8xbf16>
    %280 = vector.extract_strided_slice %252 {offsets = [0, 8], sizes = [8, 8], strides = [1, 1]} : vector<8x32xf32> to vector<8x8xf32>
    %281 = arith.truncf %280 : vector<8x8xf32> to vector<8x8xbf16>
    "tpu.trace_start"() <{level = 10 : i32, message = "td,sd->ts"}> : () -> ()
    %cst_92 = arith.constant dense<0.000000e+00> : vector<8x8xf32>
    %282 = tpu.matmul %277, %279, %cst_92 {dimension_numbers = #tpu.dot_dimension_numbers<[1], [1], [0], [0], [0, 0, 1, 0], [], []>} : vector<8x8xbf16>, vector<8x8xbf16>, vector<8x8xf32> -> vector<8x8xf32>
    "tpu.trace_stop"() : () -> ()
    %cst_93 = arith.constant 0.353553385 : f32
    %283 = vector.broadcast %cst_93 : f32 to vector<8x8xf32>
    %284 = arith.mulf %282, %283 : vector<8x8xf32>
    %cst_94 = arith.constant -1.000000e+30 : f32
    %285 = vector.broadcast %cst_94 : f32 to vector<8x8xf32>
    %286 = arith.select %12, %284, %285 : vector<8x8xi1>, vector<8x8xf32>
    %cst_95 = arith.constant dense<0xFF800000> : vector<8xf32>
    %287 = vector.multi_reduction <maximumf>, %286, %cst_95 [1] : vector<8x8xf32> to vector<8xf32>
    %288 = vector.shape_cast %287 : vector<8xf32> to vector<8x1xf32>
    %289 = vector.broadcast %288 : vector<8x1xf32> to vector<8x8xf32>
    %290 = arith.subf %286, %289 : vector<8x8xf32>
    %291 = math.exp %290 : vector<8x8xf32>
    %cst_96 = arith.constant dense<0.000000e+00> : vector<8xf32>
    %292 = vector.multi_reduction <add>, %291, %cst_96 [1] : vector<8x8xf32> to vector<8xf32>
    %293 = vector.shape_cast %292 : vector<8xf32> to vector<8x1xf32>
    %294 = tpu.reciprocal %293 {approx = true} : vector<8x1xf32> -> vector<8x1xf32>
    %295 = vector.broadcast %294 : vector<8x1xf32> to vector<8x8xf32>
    %296 = arith.mulf %291, %295 : vector<8x8xf32>
    %297 = arith.truncf %296 : vector<8x8xf32> to vector<8x8xbf16>
    %cst_97 = arith.constant dense<0.000000e+00> : vector<8x8xf32>
    %298 = tpu.matmul %297, %281, %cst_97 {dimension_numbers = #tpu.dot_dimension_numbers<[1], [0], [0], [1], [0, 0, 1, 1], [], []>} : vector<8x8xbf16>, vector<8x8xbf16>, vector<8x8xf32> -> vector<8x8xf32>
    %299 = vector.extract_strided_slice %244 {offsets = [0, 16], sizes = [8, 8], strides = [1, 1]} : vector<8x32xf32> to vector<8x8xf32>
    %300 = arith.truncf %299 : vector<8x8xf32> to vector<8x8xbf16>
    %301 = vector.extract_strided_slice %248 {offsets = [0, 16], sizes = [8, 8], strides = [1, 1]} : vector<8x32xf32> to vector<8x8xf32>
    %302 = arith.truncf %301 : vector<8x8xf32> to vector<8x8xbf16>
    %303 = vector.extract_strided_slice %252 {offsets = [0, 16], sizes = [8, 8], strides = [1, 1]} : vector<8x32xf32> to vector<8x8xf32>
    %304 = arith.truncf %303 : vector<8x8xf32> to vector<8x8xbf16>
    "tpu.trace_start"() <{level = 10 : i32, message = "td,sd->ts"}> : () -> ()
    %cst_98 = arith.constant dense<0.000000e+00> : vector<8x8xf32>
    %305 = tpu.matmul %300, %302, %cst_98 {dimension_numbers = #tpu.dot_dimension_numbers<[1], [1], [0], [0], [0, 0, 1, 0], [], []>} : vector<8x8xbf16>, vector<8x8xbf16>, vector<8x8xf32> -> vector<8x8xf32>
    "tpu.trace_stop"() : () -> ()
    %cst_99 = arith.constant 0.353553385 : f32
    %306 = vector.broadcast %cst_99 : f32 to vector<8x8xf32>
    %307 = arith.mulf %305, %306 : vector<8x8xf32>
    %cst_100 = arith.constant -1.000000e+30 : f32
    %308 = vector.broadcast %cst_100 : f32 to vector<8x8xf32>
    %309 = arith.select %12, %307, %308 : vector<8x8xi1>, vector<8x8xf32>
    %cst_101 = arith.constant dense<0xFF800000> : vector<8xf32>
    %310 = vector.multi_reduction <maximumf>, %309, %cst_101 [1] : vector<8x8xf32> to vector<8xf32>
    %311 = vector.shape_cast %310 : vector<8xf32> to vector<8x1xf32>
    %312 = vector.broadcast %311 : vector<8x1xf32> to vector<8x8xf32>
    %313 = arith.subf %309, %312 : vector<8x8xf32>
    %314 = math.exp %313 : vector<8x8xf32>
    %cst_102 = arith.constant dense<0.000000e+00> : vector<8xf32>
    %315 = vector.multi_reduction <add>, %314, %cst_102 [1] : vector<8x8xf32> to vector<8xf32>
    %316 = vector.shape_cast %315 : vector<8xf32> to vector<8x1xf32>
    %317 = tpu.reciprocal %316 {approx = true} : vector<8x1xf32> -> vector<8x1xf32>
    %318 = vector.broadcast %317 : vector<8x1xf32> to vector<8x8xf32>
    %319 = arith.mulf %314, %318 : vector<8x8xf32>
    %320 = arith.truncf %319 : vector<8x8xf32> to vector<8x8xbf16>
    %cst_103 = arith.constant dense<0.000000e+00> : vector<8x8xf32>
    %321 = tpu.matmul %320, %304, %cst_103 {dimension_numbers = #tpu.dot_dimension_numbers<[1], [0], [0], [1], [0, 0, 1, 1], [], []>} : vector<8x8xbf16>, vector<8x8xbf16>, vector<8x8xf32> -> vector<8x8xf32>
    %322 = vector.extract_strided_slice %244 {offsets = [0, 24], sizes = [8, 8], strides = [1, 1]} : vector<8x32xf32> to vector<8x8xf32>
    %323 = arith.truncf %322 : vector<8x8xf32> to vector<8x8xbf16>
    %324 = vector.extract_strided_slice %248 {offsets = [0, 24], sizes = [8, 8], strides = [1, 1]} : vector<8x32xf32> to vector<8x8xf32>
    %325 = arith.truncf %324 : vector<8x8xf32> to vector<8x8xbf16>
    %326 = vector.extract_strided_slice %252 {offsets = [0, 24], sizes = [8, 8], strides = [1, 1]} : vector<8x32xf32> to vector<8x8xf32>
    %327 = arith.truncf %326 : vector<8x8xf32> to vector<8x8xbf16>
    "tpu.trace_start"() <{level = 10 : i32, message = "td,sd->ts"}> : () -> ()
    %cst_104 = arith.constant dense<0.000000e+00> : vector<8x8xf32>
    %328 = tpu.matmul %323, %325, %cst_104 {dimension_numbers = #tpu.dot_dimension_numbers<[1], [1], [0], [0], [0, 0, 1, 0], [], []>} : vector<8x8xbf16>, vector<8x8xbf16>, vector<8x8xf32> -> vector<8x8xf32>
    "tpu.trace_stop"() : () -> ()
    %cst_105 = arith.constant 0.353553385 : f32
    %329 = vector.broadcast %cst_105 : f32 to vector<8x8xf32>
    %330 = arith.mulf %328, %329 : vector<8x8xf32>
    %cst_106 = arith.constant -1.000000e+30 : f32
    %331 = vector.broadcast %cst_106 : f32 to vector<8x8xf32>
    %332 = arith.select %12, %330, %331 : vector<8x8xi1>, vector<8x8xf32>
    %cst_107 = arith.constant dense<0xFF800000> : vector<8xf32>
    %333 = vector.multi_reduction <maximumf>, %332, %cst_107 [1] : vector<8x8xf32> to vector<8xf32>
    %334 = vector.shape_cast %333 : vector<8xf32> to vector<8x1xf32>
    %335 = vector.broadcast %334 : vector<8x1xf32> to vector<8x8xf32>
    %336 = arith.subf %332, %335 : vector<8x8xf32>
    %337 = math.exp %336 : vector<8x8xf32>
    %cst_108 = arith.constant dense<0.000000e+00> : vector<8xf32>
    %338 = vector.multi_reduction <add>, %337, %cst_108 [1] : vector<8x8xf32> to vector<8xf32>
    %339 = vector.shape_cast %338 : vector<8xf32> to vector<8x1xf32>
    %340 = tpu.reciprocal %339 {approx = true} : vector<8x1xf32> -> vector<8x1xf32>
    %341 = vector.broadcast %340 : vector<8x1xf32> to vector<8x8xf32>
    %342 = arith.mulf %337, %341 : vector<8x8xf32>
    %343 = arith.truncf %342 : vector<8x8xf32> to vector<8x8xbf16>
    %cst_109 = arith.constant dense<0.000000e+00> : vector<8x8xf32>
    %344 = tpu.matmul %343, %327, %cst_109 {dimension_numbers = #tpu.dot_dimension_numbers<[1], [0], [0], [1], [0, 0, 1, 1], [], []>} : vector<8x8xbf16>, vector<8x8xbf16>, vector<8x8xf32> -> vector<8x8xf32>
    %345 = tpu.concatenate %275, %298, %321, %344 in 1 : vector<8x8xf32>, vector<8x8xf32>, vector<8x8xf32>, vector<8x8xf32> -> vector<8x32xf32>
    %346 = arith.truncf %345 : vector<8x32xf32> to vector<8x32xbf16>
    %c1_110 = arith.constant 1 : index
    %c0_111 = arith.constant 0 : index
    %c0_112 = arith.constant 0 : index
    %347 = vector.load %arg7[%c1_110, %c0_111, %c0_112] : memref<2x32x32xbf16, #tpu.memory_space<vmem>>, vector<1x32x32xbf16>
    %348 = vector.shape_cast %347 : vector<1x32x32xbf16> to vector<32x32xbf16>
    %cst_113 = arith.constant dense<0.000000e+00> : vector<8x32xf32>
    %349 = tpu.matmul %346, %348, %cst_113 {dimension_numbers = #tpu.dot_dimension_numbers<[1], [0], [0], [1], [0, 0, 1, 1], [], []>} : vector<8x32xbf16>, vector<32x32xbf16>, vector<8x32xf32> -> vector<8x32xf32>
    %350 = vector.extract_strided_slice %214 {offsets = [3, 0], sizes = [1, 32], strides = [1, 1]} : vector<5x32xf32> to vector<1x32xf32>
    %351 = vector.broadcast %350 : vector<1x32xf32> to vector<8x32xf32>
    %352 = arith.addf %349, %351 : vector<8x32xf32>
    %353 = arith.addf %208, %352 : vector<8x32xf32>
    %354 = vector.extract_strided_slice %212 {offsets = [0, 0], sizes = [1, 32], strides = [1, 1]} : vector<2x32xf32> to vector<1x32xf32>
    %355 = vector.extract_strided_slice %212 {offsets = [1, 0], sizes = [1, 32], strides = [1, 1]} : vector<2x32xf32> to vector<1x32xf32>
    %cst_114 = arith.constant dense<0.000000e+00> : vector<8xf32>
    %356 = vector.multi_reduction <add>, %353, %cst_114 [1] : vector<8x32xf32> to vector<8xf32>
    %357 = vector.shape_cast %356 : vector<8xf32> to vector<8x1xf32>
    %cst_115 = arith.constant 3.200000e+01 : f32
    %358 = vector.broadcast %cst_115 : f32 to vector<8x1xf32>
    %359 = arith.divf %357, %358 : vector<8x1xf32>
    %360 = vector.broadcast %359 : vector<8x1xf32> to vector<8x32xf32>
    %361 = arith.subf %353, %360 : vector<8x32xf32>
    %362 = arith.mulf %361, %361 : vector<8x32xf32>
    %cst_116 = arith.constant dense<0.000000e+00> : vector<8xf32>
    %363 = vector.multi_reduction <add>, %362, %cst_116 [1] : vector<8x32xf32> to vector<8xf32>
    %364 = vector.shape_cast %363 : vector<8xf32> to vector<8x1xf32>
    %cst_117 = arith.constant 3.200000e+01 : f32
    %365 = vector.broadcast %cst_117 : f32 to vector<8x1xf32>
    %366 = arith.divf %364, %365 : vector<8x1xf32>
    %cst_118 = arith.constant 9.99999974E-6 : f32
    %367 = vector.broadcast %cst_118 : f32 to vector<8x1xf32>
    %368 = arith.addf %366, %367 : vector<8x1xf32>
    %369 = math.rsqrt %368 : vector<8x1xf32>
    %370 = vector.broadcast %369 : vector<8x1xf32> to vector<8x32xf32>
    %371 = arith.mulf %361, %370 : vector<8x32xf32>
    %372 = vector.broadcast %354 : vector<1x32xf32> to vector<8x32xf32>
    %373 = arith.mulf %371, %372 : vector<8x32xf32>
    %374 = vector.broadcast %355 : vector<1x32xf32> to vector<8x32xf32>
    %375 = arith.addf %373, %374 : vector<8x32xf32>
    %376 = arith.truncf %375 : vector<8x32xf32> to vector<8x32xbf16>
    %c1_119 = arith.constant 1 : index
    %c0_120 = arith.constant 0 : index
    %c0_121 = arith.constant 0 : index
    %377 = vector.load %arg8[%c1_119, %c0_120, %c0_121] : memref<2x32x128xbf16, #tpu.memory_space<vmem>>, vector<1x32x128xbf16>
    %378 = vector.shape_cast %377 : vector<1x32x128xbf16> to vector<32x128xbf16>
    %cst_122 = arith.constant dense<0.000000e+00> : vector<8x128xf32>
    %379 = tpu.matmul %376, %378, %cst_122 {dimension_numbers = #tpu.dot_dimension_numbers<[1], [0], [0], [1], [0, 0, 1, 1], [], []>} : vector<8x32xbf16>, vector<32x128xbf16>, vector<8x128xf32> -> vector<8x128xf32>
    %c1_123 = arith.constant 1 : index
    %c0_124 = arith.constant 0 : index
    %c0_125 = arith.constant 0 : index
    %380 = vector.load %arg10[%c1_123, %c0_124, %c0_125] : memref<2x1x128xf32, #tpu.memory_space<vmem>>, vector<1x1x128xf32>
    %381 = vector.shape_cast %380 : vector<1x1x128xf32> to vector<1x128xf32>
    %382 = vector.broadcast %381 : vector<1x128xf32> to vector<8x128xf32>
    %383 = arith.addf %379, %382 : vector<8x128xf32>
    %cst_126 = arith.constant 5.000000e-01 : f32
    %384 = vector.broadcast %cst_126 : f32 to vector<8x128xf32>
    %385 = arith.mulf %384, %383 : vector<8x128xf32>
    %cst_127 = arith.constant 4.471500e-02 : f32
    %386 = vector.broadcast %cst_127 : f32 to vector<8x128xf32>
    %387 = arith.mulf %386, %383 : vector<8x128xf32>
    %388 = arith.mulf %387, %383 : vector<8x128xf32>
    %389 = arith.mulf %388, %383 : vector<8x128xf32>
    %390 = arith.addf %383, %389 : vector<8x128xf32>
    %cst_128 = arith.constant 0.797884583 : f32
    %391 = vector.broadcast %cst_128 : f32 to vector<8x128xf32>
    %392 = arith.mulf %391, %390 : vector<8x128xf32>
    %393 = math.tanh %392 : vector<8x128xf32>
    %cst_129 = arith.constant 1.000000e+00 : f32
    %394 = vector.broadcast %cst_129 : f32 to vector<8x128xf32>
    %395 = arith.addf %394, %393 : vector<8x128xf32>
    %396 = arith.mulf %385, %395 : vector<8x128xf32>
    %397 = arith.truncf %396 : vector<8x128xf32> to vector<8x128xbf16>
    %c1_130 = arith.constant 1 : index
    %c0_131 = arith.constant 0 : index
    %c0_132 = arith.constant 0 : index
    %398 = vector.load %arg9[%c1_130, %c0_131, %c0_132] : memref<2x128x32xbf16, #tpu.memory_space<vmem>>, vector<1x128x32xbf16>
    %399 = vector.shape_cast %398 : vector<1x128x32xbf16> to vector<128x32xbf16>
    %cst_133 = arith.constant dense<0.000000e+00> : vector<8x32xf32>
    %400 = tpu.matmul %397, %399, %cst_133 {dimension_numbers = #tpu.dot_dimension_numbers<[1], [0], [0], [1], [0, 0, 1, 1], [], []>} : vector<8x128xbf16>, vector<128x32xbf16>, vector<8x32xf32> -> vector<8x32xf32>
    %401 = vector.extract_strided_slice %214 {offsets = [4, 0], sizes = [1, 32], strides = [1, 1]} : vector<5x32xf32> to vector<1x32xf32>
    %402 = vector.broadcast %401 : vector<1x32xf32> to vector<8x32xf32>
    %403 = arith.addf %400, %402 : vector<8x32xf32>
    %404 = arith.addf %353, %403 : vector<8x32xf32>
    %c4 = arith.constant 4 : index
    %c0_134 = arith.constant 0 : index
    %c0_135 = arith.constant 0 : index
    %405 = vector.load %arg4[%c4, %c0_134, %c0_135] : memref<5x2x32xf32, #tpu.memory_space<vmem>>, vector<1x2x32xf32>
    %406 = vector.shape_cast %405 : vector<1x2x32xf32> to vector<2x32xf32>
    %407 = vector.extract_strided_slice %406 {offsets = [0, 0], sizes = [1, 32], strides = [1, 1]} : vector<2x32xf32> to vector<1x32xf32>
    %408 = vector.extract_strided_slice %406 {offsets = [1, 0], sizes = [1, 32], strides = [1, 1]} : vector<2x32xf32> to vector<1x32xf32>
    %cst_136 = arith.constant dense<0.000000e+00> : vector<8xf32>
    %409 = vector.multi_reduction <add>, %404, %cst_136 [1] : vector<8x32xf32> to vector<8xf32>
    %410 = vector.shape_cast %409 : vector<8xf32> to vector<8x1xf32>
    %cst_137 = arith.constant 3.200000e+01 : f32
    %411 = vector.broadcast %cst_137 : f32 to vector<8x1xf32>
    %412 = arith.divf %410, %411 : vector<8x1xf32>
    %413 = vector.broadcast %412 : vector<8x1xf32> to vector<8x32xf32>
    %414 = arith.subf %404, %413 : vector<8x32xf32>
    %415 = arith.mulf %414, %414 : vector<8x32xf32>
    %cst_138 = arith.constant dense<0.000000e+00> : vector<8xf32>
    %416 = vector.multi_reduction <add>, %415, %cst_138 [1] : vector<8x32xf32> to vector<8xf32>
    %417 = vector.shape_cast %416 : vector<8xf32> to vector<8x1xf32>
    %cst_139 = arith.constant 3.200000e+01 : f32
    %418 = vector.broadcast %cst_139 : f32 to vector<8x1xf32>
    %419 = arith.divf %417, %418 : vector<8x1xf32>
    %cst_140 = arith.constant 9.99999974E-6 : f32
    %420 = vector.broadcast %cst_140 : f32 to vector<8x1xf32>
    %421 = arith.addf %419, %420 : vector<8x1xf32>
    %422 = math.rsqrt %421 : vector<8x1xf32>
    %423 = vector.broadcast %422 : vector<8x1xf32> to vector<8x32xf32>
    %424 = arith.mulf %414, %423 : vector<8x32xf32>
    %425 = vector.broadcast %407 : vector<1x32xf32> to vector<8x32xf32>
    %426 = arith.mulf %424, %425 : vector<8x32xf32>
    %427 = vector.broadcast %408 : vector<1x32xf32> to vector<8x32xf32>
    %428 = arith.addf %426, %427 : vector<8x32xf32>
    %429 = arith.truncf %428 : vector<8x32xf32> to vector<8x32xbf16>
    %c0_141 = arith.constant 0 : index
    %c0_142 = arith.constant 0 : index
    %430 = vector.load %arg11[%c0_141, %c0_142] : memref<32x128xbf16, #tpu.memory_space<vmem>>, vector<32x128xbf16>
    %cst_143 = arith.constant dense<0.000000e+00> : vector<8x128xf32>
    %431 = tpu.matmul %429, %430, %cst_143 {dimension_numbers = #tpu.dot_dimension_numbers<[1], [0], [0], [1], [0, 0, 1, 1], [], []>} : vector<8x32xbf16>, vector<32x128xbf16>, vector<8x128xf32> -> vector<8x128xf32>
    %c0_144 = arith.constant 0 : index
    %c0_145 = arith.constant 0 : index
    %432 = vector.load %arg12[%c0_144, %c0_145] : memref<8x128xf32, #tpu.memory_space<vmem>>, vector<8x128xf32>
    tpu.vector_store %arg12[%c0_144, %c0_145], %431 {strides = array<i32>} : memref<8x128xf32, #tpu.memory_space<vmem>>, vector<8x128xf32>,
    return
  }
  func.func @transform_0(%arg0: i32) -> (i32, i32) {
    %c0_i32 = arith.constant 0 : i32
    %c0_i32_0 = arith.constant 0 : i32
    return %arg0, %c0_i32 : i32, i32
  }
  func.func @transform_1(%arg0: i32) -> (i32, i32) {
    %c0_i32 = arith.constant 0 : i32
    %c0_i32_0 = arith.constant 0 : i32
    %c0_i32_1 = arith.constant 0 : i32
    return %c0_i32, %c0_i32_0 : i32, i32
  }
  func.func @transform_2(%arg0: i32) -> (i32, i32) {
    %c0_i32 = arith.constant 0 : i32
    %c0_i32_0 = arith.constant 0 : i32
    %c0_i32_1 = arith.constant 0 : i32
    return %c0_i32, %c0_i32_0 : i32, i32
  }
  func.func @transform_3(%arg0: i32) -> (i32, i32, i32) {
    %c0_i32 = arith.constant 0 : i32
    %c0_i32_0 = arith.constant 0 : i32
    %c0_i32_1 = arith.constant 0 : i32
    %c0_i32_2 = arith.constant 0 : i32
    return %c0_i32, %c0_i32_0, %c0_i32_1 : i32, i32, i32
  }
  func.func @transform_4(%arg0: i32) -> (i32, i32, i32) {
    %c0_i32 = arith.constant 0 : i32
    %c0_i32_0 = arith.constant 0 : i32
    %c0_i32_1 = arith.constant 0 : i32
    %c0_i32_2 = arith.constant 0 : i32
    return %c0_i32, %c0_i32_0, %c0_i32_1 : i32, i32, i32
  }
  func.func @transform_5(%arg0: i32) -> (i32, i32, i32) {
    %c0_i32 = arith.constant 0 : i32
    %c0_i32_0 = arith.constant 0 : i32
    %c0_i32_1 = arith.constant 0 : i32
    %c0_i32_2 = arith.constant 0 : i32
    return %c0_i32, %c0_i32_0, %c0_i32_1 : i32, i32, i32
  }
  func.func @transform_6(%arg0: i32) -> (i32, i32, i32) {
    %c0_i32 = arith.constant 0 : i32
    %c0_i32_0 = arith.constant 0 : i32
    %c0_i32_1 = arith.constant 0 : i32
    %c0_i32_2 = arith.constant 0 : i32
    return %c0_i32, %c0_i32_0, %c0_i32_1 : i32, i32, i32
  }
  func.func @transform_7(%arg0: i32) -> (i32, i32, i32) {
    %c0_i32 = arith.constant 0 : i32
    %c0_i32_0 = arith.constant 0 : i32
    %c0_i32_1 = arith.constant 0 : i32
    %c0_i32_2 = arith.constant 0 : i32
    return %c0_i32, %c0_i32_0, %c0_i32_1 : i32, i32, i32
  }
  func.func @transform_8(%arg0: i32) -> (i32, i32, i32) {
    %c0_i32 = arith.constant 0 : i32
    %c0_i32_0 = arith.constant 0 : i32
    %c0_i32_1 = arith.constant 0 : i32
    %c0_i32_2 = arith.constant 0 : i32
    return %c0_i32, %c0_i32_0, %c0_i32_1 : i32, i32, i32
  }
  func.func @transform_9(%arg0: i32) -> (i32, i32, i32) {
    %c0_i32 = arith.constant 0 : i32
    %c0_i32_0 = arith.constant 0 : i32
    %c0_i32_1 = arith.constant 0 : i32
    %c0_i32_2 = arith.constant 0 : i32
    return %c0_i32, %c0_i32_0, %c0_i32_1 : i32, i32, i32
  }
  func.func @transform_10(%arg0: i32) -> (i32, i32) {
    %c0_i32 = arith.constant 0 : i32
    %c0_i32_0 = arith.constant 0 : i32
    %c0_i32_1 = arith.constant 0 : i32
    return %c0_i32, %c0_i32_0 : i32, i32
  }
  func.func @transform_11(%arg0: i32) -> (i32, i32) {
    %c0_i32 = arith.constant 0 : i32
    %c0_i32_0 = arith.constant 0 : i32
    return %arg0, %c0_i32 : i32, i32
  }
}

</mosaic_0001>

<bundles_post_ra>
// kernel: tpu_custom_call.1
= control target key start
LH: loop header
LB: loop body
LE: loop exit
PB: predicated region body
PF: predicated region fallthrough
CT: control target
= control target key end

     0   :  { %16 = vsyncpa [#allocation3], 0  ;;  %s3595_s0 = inlined_call_operand.vmem [shape: s32[16,1], index: 0, kind: input, shape index: {}]   ;;  %s3596_s1 = inlined_call_operand.vmem [shape: f32[64,32], index: 1, kind: input, shape index: {}]   ;;  %s3597_s2 = inlined_call_operand.vmem [shape: f32[16,32], index: 2, kind: input, shape index: {}]   ;;  %s3598_s3 = inlined_call_operand.vmem [shape: f32[5,2,32], index: 3, kind: input, shape index: {}]   ;;  %s3599_s4 = inlined_call_operand.vmem [shape: bf16[2,32,128], index: 4, kind: input, shape index: {}]   ;;  %s3600_s5 = inlined_call_operand.vmem [shape: f32[2,5,32], index: 5, kind: input, shape index: {}]   ;;  %s3601_s6 = inlined_call_operand.vmem [shape: bf16[2,32,32], index: 6, kind: input, shape index: {}]   ;;  %s3602_s7 = inlined_call_operand.vmem [shape: bf16[2,32,128], index: 7, kind: input, shape index: {}]   ;;  %s3603_s8 = inlined_call_operand.vmem [shape: bf16[2,128,32], index: 8, kind: input, shape index: {}]   ;;  %s3604_s9 = inlined_call_operand.vmem [shape: f32[2,1,128], index: 9, kind: input, shape index: {}]   ;;  %s3605_s10 = inlined_call_operand.vmem [shape: bf16[32,128], index: 10, kind: input, shape index: {}]   ;;  %s3606_s11 = inlined_call_operand.hbm [shape: f32[16,128], index: 11, kind: output, shape index: {}]  }
   0x1   :  { %18 = vsyncpa [#allocation3 + $0x1], 0  ;;  %s3035_s17 = smov 0   ;;  %s3037_s18 = smov 0  }
   0x2   :  { %s3039_s19 = smov 0   ;;  %s3041_s20 = smov 0  }
   0x3 LB: > { %s3056_s21 = sadd.s32 4294967295, %s2953_s20   ;;  %s2352_s22 = sadd.s32 4294967294, %s2953_s20   ;;  %s2953_s20 = sphi %s3041_s20, %s3640_s20   ;;  %s2949_s19 = sphi %s3039_s19, %s3639_s19   ;;  %s2945_s18 = sphi %s3037_s18, %s3638_s18   ;;  %s2941_s17 = sphi %s3035_s17, %s3637_s17  }
   0x4   : > { %s3060_s23 = sadd.s32 1, %s2953_s20   ;;  %s267_s24 = sadd.s32 1, %s2949_s19 }
   0x5   : > { %s264_s25 = ssub.s32 %s2953_s20, %s3060_s23  ;;  %p277_p0 = scmp.ne.s32.totalorder %s2949_s19, %s2945_s18 }
   0x6   : > { %p265_p1 = scmp.eq.s32.totalorder %s264_s25, 0  ;;  %p278_p2 = scmp.eq.s32.totalorder %s3056_s21, 1 }
   0x7   : > { %p283_p3 = scmp.ne.s32.totalorder %s2945_s18, %s2941_s17  ;;  %p284_p4 = scmp.eq.s32.totalorder %s2352_s22, 1 }
   0x8   : > { %s3071_s26 = scalar_select %p265_p1, %s2949_s19, %s267_s24  }
   0x9   : > { %p3073_p5 = por %p278_p2, %p277_p0  ;;  %p3077_p6 = por %p284_p4, %p283_p3 }
   0xa   : > { %3619 = sst [smem:[#allocation5_spill]] %s3071_s26  ;;  %p2355_p7 = scmp.ge.s32.totalorder %s2953_s20, 1 }
   0xb   : > { %p339_p8 = scmp.lt.s32.totalorder %s2953_s20, 3 }
   0xd   : > { %p340_p9 = pnand %p2355_p7, %p339_p8 }
   0xe   : > { %p378_p10 = scmp.lt.s32.totalorder (!%p340_p9), %s3056_s21, 1  ;;  %v392_v0 = vld [vmem:[%s3596_s1] sm:$0xff] (!%p340_p9)  ;;  %v393_v1 = vld [vmem:[%s3596_s1 + $0x8] sm:$0xff] (!%p340_p9)  ;;  %v394_v2 = vld [vmem:[%s3596_s1 + $0x10] sm:$0xff] (!%p340_p9)  ;;  %v2955_v3 = vmov (!%p340_p9), 0   ;;  %v2956_v4 = vmov (!%p340_p9), 0.0|0.0   ;;  %v384_v16 = vlaneseq (!%p340_p9) }
   0xf   : > { %343 = sbr.rel (%p340_p9) target bundleno = 7103 (0x1bbf), region = 64  ;;  %2814 = vset.pattern.permute.xlu0 (!%p340_p9), %v2955_v3  ;;  %2744 = vmatprep.subr.bf16.mxu0 (!%p340_p9), %v2956_v4  ;;  %v2745_v5 = vpack.c.bf16 (!%p340_p9), %v393_v1, %v392_v0  ;;  %v395_v6 = vld [vmem:[%s3596_s1 + $0x18] sm:$0xff] (!%p340_p9)  ;;  %v2957_v7 = vmov (!%p340_p9), 0.0   ;;  %v396_v9 = vld [vmem:[%s3596_s1 + $0x20] sm:$0xff] (!%p340_p9)  ;;  %v397_v10 = vld [vmem:[%s3596_s1 + $0x28] sm:$0xff] (!%p340_p9)  ;;  %vm2958_vm0 = vmmov (!%p340_p9), 0  }
  0x10   : > { %2552 = vmatprep.subr.bf16.mxu1 (!%p340_p9), %v2957_v7  ;;  %v2748_v8 = vpack.c.bf16 (!%p340_p9), %v395_v6, %v394_v2  ;;  %v2751_v12 = vpack.c.bf16 (!%p340_p9), %v397_v10, %v396_v9  ;;  %v398_v13 = vld [vmem:[%s3596_s1 + $0x30] sm:$0xff] (!%p340_p9)  ;;  %v399_v14 = vld [vmem:[%s3596_s1 + $0x38] sm:$0xff] (!%p340_p9)  ;;  %2549 = vmatprep.mubr.msk.f32.mxu0 (!%p340_p9), %vm2958_vm0, %v2957_v7  ;;  %v3118_v17 = vand.u32 (!%p340_p9), 127, %v384_v16  ;;  %vm401_vm1 = vcmask (!%p340_p9), 523264   ;;  %v400_v20 = vld [vmem:[%s3597_s2] sm:$0xff] (!%p340_p9)  ;;  %s2959_s22 = smov (!%p340_p9), 32  }
  0x11   : > { %2746 = vmatpush3.bf16.msra.mxu0 (!%p340_p9), %v2745_v5  ;;  %2556 = vmatprep.mubr.msk.bf16.mxu1 (!%p340_p9), %vm2958_vm0, %v2957_v7  ;;  %v2754_v15 = vpack.c.bf16 (!%p340_p9), %v399_v14, %v398_v13  ;;  %vm482_vm3 = vcmask (!%p340_p9), 261120   ;;  %v2815_v30 = vld [vmem:[%s3599_s4] sm:$0xff] (!%p340_p9)   ;;  %v2816_v31 = vld [vmem:[%s3599_s4 + $0x8] sm:$0xff] (!%p340_p9)   ;;  %v3141_v32 = vshrl.u32 (!%p340_p9), %v384_v16, 7  ;;  %vm596_vm4 = vcmask (!%p340_p9), 64512   ;;  %s3612_s30 = smov (!%p340_p9), 88  }
  0x12   : > { %2747 = vmatprep.subr.bf16.mxu0 (!%p340_p9), %v2956_v4  ;;  %2553 = vmatpush3.bf16.msra.mxu1 (!%p340_p9), %v2815_v30  ;;  %v3149_v34 = vld [vmem:[%s3600_s5] sm:$0x1f] (!%p340_p9)  ;;  %s3618_s12 = smov (!%p340_p9), 120   ;;  %s3617_s13 = smov (!%p340_p9), 80   ;;  %vm663_vm6 = vcmask (!%p340_p9), 1043456   ;;  %vm1057_vm7 = vcmask (!%p340_p9), 130048  }
  0x13   : > { %2554 = vmatprep.subr.bf16.mxu1 (!%p340_p9), %v2957_v7  ;;  %v3144_v33 = vsub.s32 (!%p340_p9), 1, %v3141_v32  ;;  %v583_v35 = vsub.s32 (!%p340_p9), 2, %v3141_v32  ;;  %v3160_v41 = vsub.s32 (!%p340_p9), 0, %v3141_v32  ;;  %v478_v42 = vld [vmem:[%s3598_s3] sm:$0x3] (!%p340_p9)  ;;  %vm3180_vm5 = vcmp.ge.s32.totalorder (!%p340_p9), %v3141_v32, %v3118_v17  ;;  %s3616_s14 = smov (!%p340_p9), 72  }
  0x14   : > { %s3607_s15 = smov (!%p340_p9), 104   ;;  %s3610_s29 = smov (!%p340_p9), 48   ;;  %vm1059_vm8 = vcmask (!%p340_p9), 195584  }
  0x15   : > { %2749 = vmatpush3.bf16.msra.mxu0 (!%p340_p9), %v2748_v8  ;;  %v575_v36 = vrot.slane (!%p340_p9), %v3149_v34, %v3144_v33  ;;  %v584_v37 = vrot.slane (!%p340_p9), %v3149_v34, %v583_v35  ;;  %v500_v43 = vrot.slane (!%p340_p9), %v478_v42, %v3160_v41  ;;  %v505_v46 = vrot.slane (!%p340_p9), %v478_v42, %v3144_v33  ;;  %s3609_s26 = smov (!%p340_p9), 56  }
  0x16   : > { %s379_s24 = scalar_select %p378_p10, %s3056_s21, 1  ;;  %2750 = vmatprep.subr.bf16.mxu0 %v2956_v4  ;;  %2555 = vmatpush3.bf16.msra.mxu1 %v2816_v31  ;;  %v570_v57 = vrot.slane %v3149_v34, %v3160_v41 }
  0x17   : > { %2560 = vmatprep.subr.bf16.mxu1 %v2957_v7 }
  0x18   : > { %s2357_s25 = sshll.u32 %s379_s24, 3  ;;  %s2960_s24 = smov 64  }
  0x19   : > { %s381_s16 = scalar_lea.vmem %s3595_s0, %s2357_s25  ;;  %2752 = vmatpush3.bf16.msra.mxu0 %v2751_v12  ;;  %s2961_s25 = smov 96  }
  0x1a   : > { %v383_v11 = vld [vmem:[%s381_s16] sm:$0xff]  ;;  %2753 = vmatprep.subr.bf16.mxu0 %v2956_v4  ;;  %s3611_s16 = smov 112  }
  0x1b   : > { %387 = vperm.xlu0 %2814, %v383_v11  }
  0x1d   : > { %2755 = vmatpush3.bf16.msra.mxu0 %v2754_v15 }
  0x1e   : > { %2578 = vmatprep.subr.bf16.mxu0 %v2957_v7 }
  0x9a   : > { %v388_v18 = vpop.permute.xlu0 %387 }
  0x9b   : > { %vm389_vm2 = vcmp.eq.s32.totalorder %v388_v18, %v3118_v17 }
  0x9c   : > { %v2358_v19 = vsel %vm389_vm2, 1.0, %v2957_v7 }
  0x9d   : > { %2550 = vmatmul.mubr.msk.f32.vlgmr.msra.gmra.mrb[0].mxu0 %vm401_vm1, %v2358_v19 }
  0x9e   : > { %2580 = vmatprep.mubr.msk.bf16.mxu0 %vm2958_vm0, %v2957_v7 }
 0x170   : > { %v471_v21 = vpop.f32.mrb[0].mxu0 }
 0x171   : > { %v3127_v22 = vadd.f32 %v471_v21, %v400_v20  ;;  %v2551_v23 = vpop.f32.mrb[1].mxu0 }
 0x173   : > { %v483_v24 = vsel %vm482_vm3, %v3127_v22, 0.0 }
 0x174   : > { %484 = vadd.xlane.f32.xlu0 %v483_v24 }
 0x18a   : > { %586 = vrot.lane.b32.xlu0 %v584_v37, %s2960_s24 }
 0x201   : > { %v485_v25 = vpop.xlane.xlu0 %484 }
 0x202   : > { %v487_v26 = vmul.f32 0.03125, %v485_v25 }
 0x204   : > { %v488_v27 = vsub.f32 %v3127_v22, %v487_v26 }
 0x205   : > { %v587_v6 = vpop.permute.xlu0 %586 }
 0x206   : > { %v489_v28 = vmul.f32 %v488_v27, %v488_v27 }
 0x208   : > { %v490_v29 = vsel %vm482_vm3, %v489_v28, 0.0 }
 0x209   : > { %491 = vadd.xlane.f32.xlu1 %v490_v29 }
 0x21a   : > { %577 = vrot.lane.b32.xlu1 %v575_v36, %s2959_s22 }
 0x296   : > { %v492_v38 = vpop.xlane.xlu1 %491 }
 0x297   : > { %v493_v39 = vmul.f32 0.03125, %v492_v38 }
 0x299   : > { %v494_v40 = vadd.f32 1e-05, %v493_v39 }
 0x29a   : > { %v578_v50 = vpop.permute.xlu1 %577 }
 0x29b   : > { %2845 = vrsqrt.f32 %v494_v40 }
 0x2a5   : > { %v2846_v44 = vpop.eup %2845 }
 0x2a6   : > { %v496_v45 = vmul.f32 %v2846_v44, %v488_v27 }
 0x2a8   : > { %v501_v47 = vmul.f32 %v500_v43, %v496_v45 }
 0x2aa   : > { %v506_v48 = vadd.f32 %v505_v46, %v501_v47 }
 0x2ac   : > { %v507_v49 = vpack.c.bf16 %v506_v48, %v506_v48 }
 0x2ae   : > { %2557 = vmatmul.mubr.msk.bf16.vlgmr.msra.gmra.mrb[0].mxu1 %vm482_vm3, %v507_v49 }
 0x2af   : > { %2562 = vmatprep.mubr.msk.bf16.mxu1 %vm2958_vm0, %v2957_v7 }
 0x381   : > { %v561_v51 = vpop.f32.mrb[0].mxu1 }
 0x382   : > { %v580_v52 = vadd.f32 %v578_v50, %v561_v51  ;;  %v2558_v53 = vpop.f32.mrb[1].mxu1  ;;  %v571_v60 = vadd.f32 %v570_v57, %v561_v51  ;;  %v589_v8 = vadd.f32 %v587_v6, %v561_v51 }
 0x383   : > { %v564_v54 = vpop.f32.mrb[2].mxu1 }
 0x384   : > { %v591_v55 = vpack.c.bf16 %v580_v52, %v580_v52  ;;  %v2559_v56 = vpop.f32.mrb[3].mxu1  ;;  %v590_v61 = vpack.c.bf16 %v571_v60, %v571_v60  ;;  %v3187_v9 = vpack.c.bf16 %v589_v8, %v589_v8 }
 0x386   : > { %594 = vrot.lane.b32.xlu1 %v591_v55, %s2961_s25 }
 0x3f8   : > { %v595_v58 = vpop.permute.xlu1 %594 }
 0x3f9   : > { %v601_v59 = vsel %vm596_vm4, %v595_v58, 0 }
 0x3fa   : > { %2561 = vmatpush3.bf16.xpose.msra.mxu1 %v601_v59 }
 0x3fb   : > { %2566 = vmatprep.subr.bf16.mxu1 %v2957_v7 }
 0x401   : > { %2563 = vmatmul.mubr.msk.bf16.vlgmr.msra.gmra.mrb[4].mxu1 %vm596_vm4, %v590_v61 }
 0x402   : > { %2568 = vmatprep.mubr.msk.bf16.mxu1 %vm2958_vm0, %v2957_v7 }
 0x4d4   : > { %v637_v63 = vpop.f32.mrb[4].mxu1 }
 0x4d5   : > { %v643_v0 = vmul.f32 0.35355338, %v637_v63  ;;  %v2564_v1 = vpop.f32.mrb[5].mxu1 }
 0x4d6   : > { %v640_v2 = vpop.f32.mrb[6].mxu1 }
 0x4d7   : > { %v2565_v3 = vpop.f32.mrb[7].mxu1  ;;  %v644_v4 = vsel %vm3180_vm5, %v643_v0, -1e+30 }
 0x4d8   : > { %v645_v5 = vsel %vm596_vm4, %v644_v4, -inf }
 0x4d9   : > { %646 = vmax.xlane.f32.xlu1 %v645_v5 }
 0x4ea   : > { %658 = vrot.lane.b32.xlu1 %v3187_v9, %s2960_s24 }
 0x4ee   : > { %710 = vrot.lane.b32.xlu1 %v591_v55, %s3612_s30  ;;  %s3631_s30 = smov 56  }
 0x4f2   : > { %708 = vrot.lane.b32.xlu1 %v590_v61, %s3618_s12  ;;  %s3632_s12 = smov 40  }
 0x4f6   : > { %822 = vrot.lane.b32.xlu1 %v591_v55, %s3617_s13 }
 0x4fa   : > { %934 = vrot.lane.b32.xlu1 %v591_v55, %s3616_s14  ;;  %s3626_s14 = smov 72  }
 0x4fe   : > { %932 = vrot.lane.b32.xlu1 %v590_v61, %s3607_s15  ;;  %s3608_s15 = smov 40  }
 0x566   : > { %v647_v10 = vpop.xlane.xlu1 %646 }
 0x567   : > { %v648_v11 = vsub.f32 %v644_v4, %v647_v10 }
 0x569   : > { %v649_v12 = vmul.f32 1.442695, %v648_v11 }
 0x56a   : > { %v659_v13 = vpop.permute.xlu1 %658 }
 0x56b   : > { %2847 = vpow2.f32 %v649_v12  ;;  %v665_v14 = vsel %vm663_vm6, %v659_v13, 0 }
 0x56c   : > { %2567 = vmatpush3.bf16.msra.mxu1 %v665_v14 }
 0x56d   : > { %2572 = vmatprep.subr.bf16.mxu1 %v2957_v7 }
 0x56e   : > { %v711_v18 = vpop.permute.xlu1 %710 }
 0x56f   : > { %v716_v24 = vsel %vm596_vm4, %v711_v18, 0 }
 0x572   : > { %v709_v23 = vpop.permute.xlu1 %708 }
 0x575   : > { %v2848_v15 = vpop.eup %2847 }
 0x576   : > { %v651_v16 = vsel %vm596_vm4, %v2848_v15, 0.0  ;;  %v823_v25 = vpop.permute.xlu1 %822 }
 0x577   : > { %652 = vadd.xlane.f32.xlu0 %v651_v16  ;;  %v828_v26 = vsel %vm596_vm4, %v823_v25, 0 }
 0x57a   : > { %v935_v27 = vpop.permute.xlu1 %934 }
 0x57b   : > { %v940_v29 = vsel %vm596_vm4, %v935_v27, 0 }
 0x57e   : > { %v933_v30 = vpop.permute.xlu1 %932 }
 0x58d   : > { %820 = vrot.lane.b32.xlu0 %v590_v61, %s3611_s16  ;;  %s3614_s16 = smov 16  }
 0x604   : > { %v653_v17 = vpop.xlane.xlu0 %652 }
 0x605   : > { %2849 = vrcp.f32 %v653_v17 }
 0x608   : > { %v821_v28 = vpop.permute.xlu0 %820 }
 0x60f   : > { %v2850_v19 = vpop.eup %2849 }
 0x610   : > { %v655_v20 = vmul.f32 %v2850_v19, %v2848_v15 }
 0x612   : > { %v656_v21 = vpack.c.bf16 %v655_v20, %v655_v20 }
 0x614   : > { %2569 = vmatmul.mubr.msk.bf16.vlgmr.msra.gmra.mrb[8].mxu1 %vm596_vm4, %v656_v21 }
 0x615   : > { %2573 = vmatpush3.bf16.xpose.msra.mxu1 %v716_v24  ;;  %2574 = vmatprep.mubr.msk.bf16.mxu1 %vm2958_vm0, %v2957_v7 }
 0x616   : > { %2584 = vmatprep.subr.bf16.mxu1 %v2957_v7 }
 0x61c   : > { %2575 = vmatmul.mubr.msk.bf16.vlgmr.msra.gmra.mrb[12].mxu1 %vm596_vm4, %v709_v23 }
 0x61d   : > { %2585 = vmatpush3.bf16.xpose.msra.mxu1 %v828_v26  ;;  %2586 = vmatprep.mubr.msk.bf16.mxu1 %vm2958_vm0, %v2957_v7 }
 0x61e   : > { %2596 = vmatprep.subr.bf16.mxu1 %v2957_v7 }
 0x624   : > { %2587 = vmatmul.mubr.msk.bf16.vlgmr.msra.gmra.mrb[16].mxu1 %vm596_vm4, %v821_v28 }
 0x625   : > { %2597 = vmatpush3.bf16.xpose.msra.mxu1 %v940_v29  ;;  %2598 = vmatprep.mubr.msk.bf16.mxu1 %vm2958_vm0, %v2957_v7 }
 0x626   : > { %2608 = vmatprep.subr.bf16.mxu1 %v2957_v7 }
 0x62c   : > { %2599 = vmatmul.mubr.msk.bf16.vlgmr.msra.gmra.mrb[20].mxu1 %vm596_vm4, %v933_v30 }
 0x62d   : > { %2612 = vmatprep.mubr.msk.bf16.mxu1 %vm2958_vm0, %v2957_v7 }
 0x6e7   : > { %v3218_v31 = vpop.f32.mrb[8].mxu1 }
 0x6e8   : > { %v2570_v36 = vpop.f32.mrb[9].mxu1 }
 0x6e9   : > { %v704_v37 = vpop.f32.mrb[10].mxu1 }
 0x6ea   : > { %v2571_v38 = vpop.f32.mrb[11].mxu1 }
 0x6eb   : > { %v2817_v38 = vld [vmem:[%s3601_s6] sm:$0xff]  }
 0x6ec   : > { %2609 = vmatpush3.bf16.msra.mxu1 %v2817_v38 }
 0x6ed   : > { %2610 = vmatprep.subr.bf16.mxu1 %v2957_v7 }
 0x6ef   : > { %v752_v39 = vpop.f32.mrb[12].mxu1 }
 0x6f0   : > { %v758_v40 = vmul.f32 0.35355338, %v752_v39  ;;  %v2576_v42 = vpop.f32.mrb[13].mxu1 }
 0x6f1   : > { %v755_v43 = vpop.f32.mrb[14].mxu1 }
 0x6f2   : > { %v2577_v44 = vpop.f32.mrb[15].mxu1  ;;  %v759_v45 = vsel %vm3180_vm5, %v758_v40, -1e+30 }
 0x6f3   : > { %v760_v46 = vsel %vm596_vm4, %v759_v45, -inf }
 0x6f4   : > { %761 = vmax.xlane.f32.xlu1 %v760_v46 }
 0x6f7   : > { %v864_v47 = vpop.f32.mrb[16].mxu1 }
 0x6f8   : > { %v870_v48 = vmul.f32 0.35355338, %v864_v47  ;;  %v2588_v49 = vpop.f32.mrb[17].mxu1 }
 0x6f9   : > { %v867_v50 = vpop.f32.mrb[18].mxu1 }
 0x6fa   : > { %v2589_v51 = vpop.f32.mrb[19].mxu1  ;;  %v871_v52 = vsel %vm3180_vm5, %v870_v48, -1e+30  ;;  %v2818_v48 = vld [vmem:[%s3601_s6 + $0x8] sm:$0xff]  }
 0x6fb   : > { %v872_v53 = vsel %vm596_vm4, %v871_v52, -inf  ;;  %2611 = vmatpush3.bf16.msra.mxu1 %v2818_v48 }
 0x6fc   : > { %873 = vmax.xlane.f32.xlu0 %v872_v53  ;;  %2624 = vmatprep.subr.bf16.mxu1 %v2957_v7 }
 0x6ff   : > { %v976_v54 = vpop.f32.mrb[20].mxu1 }
 0x700   : > { %v982_v55 = vmul.f32 0.35355338, %v976_v54  ;;  %v2600_v56 = vpop.f32.mrb[21].mxu1 }
 0x701   : > { %v979_v57 = vpop.f32.mrb[22].mxu1 }
 0x702   : > { %v2601_v58 = vpop.f32.mrb[23].mxu1  ;;  %v983_v59 = vsel %vm3180_vm5, %v982_v55, -1e+30 }
 0x703   : > { %v984_v60 = vsel %vm596_vm4, %v983_v59, -inf }
 0x704   : > { %985 = vmax.xlane.f32.xlu1 %v984_v60  ;;  %v1068_v60 = vsub.s32 3, %v3141_v32 }
 0x781   : > { %v762_v61 = vpop.xlane.xlu1 %761 }
 0x782   : > { %v763_v63 = vsub.f32 %v759_v45, %v762_v61  ;;  %v1069_v61 = vrot.slane %v3149_v34, %v1068_v60 }
 0x784   : > { %v764_v0 = vmul.f32 1.442695, %v763_v63 }
 0x786   : > { %2851 = vpow2.f32 %v764_v0 }
 0x789   : > { %v874_v1 = vpop.xlane.xlu0 %873 }
 0x78a   : > { %v875_v2 = vsub.f32 %v871_v52, %v874_v1 }
 0x78c   : > { %v876_v3 = vmul.f32 1.442695, %v875_v2 }
 0x78e   : > { %2853 = vpow2.f32 %v876_v3 }
 0x790   : > { %v2852_v4 = vpop.eup %2851 }
 0x791   : > { %v766_v5 = vsel %vm596_vm4, %v2852_v4, 0.0  ;;  %v986_v10 = vpop.xlane.xlu1 %985 }
 0x792   : > { %767 = vadd.xlane.f32.xlu1 %v766_v5  ;;  %v987_v11 = vsub.f32 %v983_v59, %v986_v10 }
 0x794   : > { %v988_v12 = vmul.f32 1.442695, %v987_v11 }
 0x796   : > { %2855 = vpow2.f32 %v988_v12  ;;  %v2819_v12 = vld [vmem:[%s3602_s7] sm:$0xff]  }
 0x798   : > { %v2854_v6 = vpop.eup %2853 }
 0x799   : > { %v878_v8 = vsel %vm596_vm4, %v2854_v6, 0.0 }
 0x79a   : > { %879 = vadd.xlane.f32.xlu0 %v878_v8 }
 0x7a0   : > { %v2856_v13 = vpop.eup %2855 }
 0x7a1   : > { %v990_v14 = vsel %vm596_vm4, %v2856_v13, 0.0 }
 0x7a3   : > { %884 = vrot.lane.b32.xlu1 %v3187_v9, %s3610_s29  ;;  %s3615_s29 = smov 8  }
 0x7b0   : > { %772 = vrot.lane.b32.xlu0 %v3187_v9, %s3609_s26  ;;  %s3613_s26 = smov 24  }
 0x7c7   : > { %991 = vadd.xlane.f32.xlu1 %v990_v14 }
 0x7d8   : > { %996 = vrot.lane.b32.xlu1 %v3187_v9, %s3608_s15 }
 0x81f   : > { %v768_v15 = vpop.xlane.xlu1 %767 }
 0x820   : > { %2857 = vrcp.f32 %v768_v15 }
 0x823   : > { %v885_v21 = vpop.permute.xlu1 %884 }
 0x824   : > { %v890_v24 = vsel %vm663_vm6, %v885_v21, 0 }
 0x827   : > { %v880_v16 = vpop.xlane.xlu0 %879 }
 0x828   : > { %2859 = vrcp.f32 %v880_v16 }
 0x82a   : > { %v2858_v17 = vpop.eup %2857 }
 0x82b   : > { %v770_v18 = vmul.f32 %v2858_v17, %v2852_v4  ;;  %v773_v19 = vpop.permute.xlu0 %772  ;;  %v2360_v17 = vld [vmem:[%s3598_s3 + $0x2] sm:$0x3] }
 0x82c   : > { %v778_v20 = vsel %vm663_vm6, %v773_v19, 0  ;;  %v1147_v21 = vrot.slane %v2360_v17, %v3144_v33 }
 0x82d   : > { %2579 = vmatpush3.bf16.msra.mxu0 %v778_v20  ;;  %v771_v23 = vpack.c.bf16 %v770_v18, %v770_v18  ;;  %v1142_v18 = vrot.slane %v2360_v17, %v3160_v41 }
 0x82e   : > { %2590 = vmatprep.subr.bf16.mxu0 %v2957_v7 }
 0x830   : > { %2581 = vmatmul.mubr.msk.bf16.vlgmr.msra.gmra.mrb[4].mxu0 %vm596_vm4, %v771_v23 }
 0x831   : > { %2591 = vmatpush3.bf16.msra.mxu0 %v890_v24  ;;  %2592 = vmatprep.mubr.msk.bf16.mxu0 %vm2958_vm0, %v2957_v7 }
 0x832   : > { %v2860_v9 = vpop.eup %2859  ;;  %2602 = vmatprep.subr.bf16.mxu0 %v2957_v7 }
 0x833   : > { %v882_v25 = vmul.f32 %v2860_v9, %v2854_v6 }
 0x835   : > { %v883_v26 = vpack.c.bf16 %v882_v25, %v882_v25  ;;  %v2822_v25 = vld [vmem:[%s3603_s8 + $0x8] sm:$0xff]  }
 0x838   : > { %2593 = vmatmul.mubr.msk.bf16.vlgmr.msra.gmra.mrb[8].mxu0 %vm596_vm4, %v883_v26  ;;  %v2823_v26 = vld [vmem:[%s3603_s8 + $0x10] sm:$0xff]  }
 0x839   : > { %2604 = vmatprep.mubr.msk.bf16.mxu0 %vm2958_vm0, %v2957_v7 }
 0x854   : > { %v992_v27 = vpop.xlane.xlu1 %991 }
 0x855   : > { %2861 = vrcp.f32 %v992_v27  ;;  %v2824_v27 = vld [vmem:[%s3603_s8 + $0x18] sm:$0xff]  }
 0x858   : > { %v997_v28 = vpop.permute.xlu1 %996 }
 0x859   : > { %v1002_v29 = vsel %vm663_vm6, %v997_v28, 0  ;;  %v2825_v28 = vld [vmem:[%s3603_s8 + $0x20] sm:$0xff]  }
 0x85a   : > { %2603 = vmatpush3.bf16.msra.mxu0 %v1002_v29  ;;  %v2826_v29 = vld [vmem:[%s3603_s8 + $0x28] sm:$0xff]  }
 0x85b   : > { %2616 = vmatprep.subr.bf16.mxu0 %v2957_v7 }
 0x85f   : > { %v2862_v30 = vpop.eup %2861 }
 0x860   : > { %v994_v36 = vmul.f32 %v2862_v30, %v2856_v13  ;;  %v2821_v13 = vld [vmem:[%s3603_s8] sm:$0xff]   ;;  %v2827_v30 = vld [vmem:[%s3603_s8 + $0x30] sm:$0xff]  }
 0x862   : > { %v995_v37 = vpack.c.bf16 %v994_v36, %v994_v36  ;;  %v2828_v36 = vld [vmem:[%s3603_s8 + $0x38] sm:$0xff]  }
 0x864   : > { %2605 = vmatmul.mubr.msk.bf16.vlgmr.msra.gmra.mrb[12].mxu0 %vm596_vm4, %v995_v37  ;;  %v2375_v37 = vld [vmem:[%s3604_s9] ss:$0 sm:$0xff] }
 0x865   : > { %2620 = vmatprep.mubr.msk.bf16.mxu0 %vm2958_vm0, %v2957_v7  ;;  %2617 = vmatpush3.bf16.msra.mxu0 %v2819_v12 }
 0x866   : > { %2618 = vmatprep.subr.bf16.mxu0 %v2957_v7 }
 0x903   : > { %v814_v39 = vpop.f32.mrb[4].mxu0 }
 0x904   : > { %1045 = vrot.lane.b32.xlu0 %v814_v39, %s3615_s29  ;;  %v2582_v40 = vpop.f32.mrb[5].mxu0  ;;  %s3629_s29 = smov 104  }
 0x905   : > { %v817_v42 = vpop.f32.mrb[6].mxu0 }
 0x906   : > { %v2583_v43 = vpop.f32.mrb[7].mxu0 }
 0x90b   : > { %v926_v44 = vpop.f32.mrb[8].mxu0 }
 0x90c   : > { %1049 = vrot.lane.b32.xlu1 %v926_v44, %s3614_s16  ;;  %v2594_v45 = vpop.f32.mrb[9].mxu0  ;;  %s3628_s16 = smov 112  }
 0x90d   : > { %v929_v46 = vpop.f32.mrb[10].mxu0 }
 0x90e   : > { %v2595_v47 = vpop.f32.mrb[11].mxu0 }
 0x937   : > { %v1038_v49 = vpop.f32.mrb[12].mxu0 }
 0x938   : > { %1053 = vrot.lane.b32.xlu0 %v1038_v49, %s3613_s26  ;;  %v2606_v50 = vpop.f32.mrb[13].mxu0  ;;  %s3630_s26 = smov 48  }
 0x939   : > { %v1041_v51 = vpop.f32.mrb[14].mxu0 }
 0x93a   : > { %v2607_v52 = vpop.f32.mrb[15].mxu0 }
 0x976   : > { %v1046_v53 = vpop.permute.xlu0 %1045 }
 0x977   : > { %v1056_v55 = vsel %vm596_vm4, %v3218_v31, %v1046_v53 }
 0x97e   : > { %v1050_v54 = vpop.permute.xlu1 %1049 }
 0x97f   : > { %v1058_v56 = vsel %vm1057_vm7, %v1056_v55, %v1050_v54  ;;  %v1244_v54 = vsub.s32 4, %v3141_v32  ;;  %v2843_v32 = vld [vmem:[%s3605_s10] sm:$0xff]  }
 0x981   : > { %v1245_v55 = vrot.slane %v3149_v34, %v1244_v54  ;;  %v2829_v34 = vld [vmem:[%s3599_s4 + $0x10] sm:$0xff]  }
 0x9aa   : > { %v1054_v57 = vpop.permute.xlu0 %1053 }
 0x9ab   : > { %v1060_v58 = vsel %vm1059_vm8, %v1058_v56, %v1054_v57 }
 0x9ac   : > { %v1061_v59 = vpack.c.bf16 %v1060_v58, %v1060_v58 }
 0x9ae   : > { %2613 = vmatmul.mubr.msk.bf16.vlgmr.msra.gmra.mrb[24].mxu1 %vm482_vm3, %v1061_v59 }
 0x9af   : > { %2640 = vmatprep.mubr.msk.bf16.mxu1 %vm2958_vm0, %v2957_v7  ;;  %2625 = vmatpush3.bf16.msra.mxu1 %v2821_v13  ;;  %v2387_v13 = vld [vmem:[%s3598_s3 + $0x4] sm:$0x3] }
 0x9b0   : > { %2626 = vmatprep.subr.bf16.mxu1 %v2957_v7  ;;  %v1362_v17 = vrot.slane %v2387_v13, %v3144_v33 }
 0x9b3   : > { %2627 = vmatpush3.bf16.msra.mxu1 %v2822_v25 }
 0x9b4   : > { %2628 = vmatprep.subr.bf16.mxu1 %v2957_v7 }
 0x9b7   : > { %2629 = vmatpush3.bf16.msra.mxu1 %v2823_v26 }
 0x9b8   : > { %2630 = vmatprep.subr.bf16.mxu1 %v2957_v7 }
 0x9bb   : > { %2631 = vmatpush3.bf16.msra.mxu1 %v2824_v27 }
 0x9bc   : > { %2632 = vmatprep.subr.bf16.mxu1 %v2957_v7 }
 0x9bf   : > { %2633 = vmatpush3.bf16.msra.mxu1 %v2825_v28 }
 0x9c0   : > { %2634 = vmatprep.subr.bf16.mxu1 %v2957_v7 }
 0x9c3   : > { %2635 = vmatpush3.bf16.msra.mxu1 %v2826_v29 }
 0x9c4   : > { %2636 = vmatprep.subr.bf16.mxu1 %v2957_v7 }
 0x9c7   : > { %2637 = vmatpush3.bf16.msra.mxu1 %v2827_v30 }
 0x9c8   : > { %2638 = vmatprep.subr.bf16.mxu1 %v2957_v7 }
 0x9cb   : > { %2639 = vmatpush3.bf16.msra.mxu1 %v2828_v36 }
 0x9cc   : > { %2670 = vmatprep.subr.bf16.mxu1 %v2957_v7 }
 0xa81   : > { %v1119_v63 = vpop.f32.mrb[24].mxu1 }
 0xa82   : > { %v1120_v0 = vadd.f32 %v1119_v63, %v1069_v61  ;;  %v2614_v31 = vpop.f32.mrb[25].mxu1 }
 0xa83   : > { %v1122_v1 = vpop.f32.mrb[26].mxu1 }
 0xa84   : > { %v3276_v2 = vadd.f32 %v1120_v0, %v3127_v22  ;;  %v2615_v3 = vpop.f32.mrb[27].mxu1  ;;  %v2820_v22 = vld [vmem:[%s3602_s7 + $0x8] sm:$0xff]  }
 0xa85   : > { %2619 = vmatpush3.bf16.msra.mxu0 %v2820_v22 }
 0xa86   : > { %v1126_v4 = vsel %vm482_vm3, %v3276_v2, 0.0  ;;  %2644 = vmatprep.subr.bf16.mxu0 %v2957_v7 }
 0xa87   : > { %1127 = vadd.xlane.f32.xlu1 %v1126_v4 }
 0xb14   : > { %v1128_v5 = vpop.xlane.xlu1 %1127 }
 0xb15   : > { %v1129_v6 = vmul.f32 0.03125, %v1128_v5 }
 0xb17   : > { %v1130_v8 = vsub.f32 %v3276_v2, %v1129_v6  ;;  %v3357_v6 = vld [vmem:[%s3600_s5 + $0x8] sm:$0x1f] }
 0xb18   : > { %v1428_v27 = vrot.slane %v3357_v6, %v3160_v41 }
 0xb19   : > { %v1131_v10 = vmul.f32 %v1130_v8, %v1130_v8 }
 0xb1b   : > { %v1132_v11 = vsel %vm482_vm3, %v1131_v10, 0.0  ;;  %v1442_v10 = vrot.slane %v3357_v6, %v583_v35 }
 0xb1c   : > { %1133 = vadd.xlane.f32.xlu0 %v1132_v11 }
 0xba9   : > { %v1134_v14 = vpop.xlane.xlu0 %1133 }
 0xbaa   : > { %v1135_v15 = vmul.f32 0.03125, %v1134_v14  ;;  %v1357_v14 = vrot.slane %v2387_v13, %v3160_v41 }
 0xbac   : > { %v1136_v16 = vadd.f32 1e-05, %v1135_v15 }
 0xbae   : > { %2863 = vrsqrt.f32 %v1136_v16 }
 0xbb8   : > { %v2864_v19 = vpop.eup %2863 }
 0xbb9   : > { %v1138_v20 = vmul.f32 %v2864_v19, %v1130_v8  ;;  %v1433_v8 = vrot.slane %v3357_v6, %v3144_v33 }
 0xbbb   : > { %v1143_v23 = vmul.f32 %v1142_v18, %v1138_v20 }
 0xbbd   : > { %v1148_v24 = vadd.f32 %v1147_v21, %v1143_v23 }
 0xbbf   : > { %v1149_v9 = vpack.c.bf16 %v1148_v24, %v1148_v24 }
 0xbc1   : > { %2621 = vmatmul.mubr.msk.bf16.vlgmr.msra.gmra.mrb[16].mxu0 %vm482_vm3, %v1149_v9 }
 0xbc2   : > { %2648 = vmatprep.mubr.msk.bf16.mxu0 %vm2958_vm0, %v2957_v7  ;;  %2645 = vmatpush3.bf16.msra.mxu0 %v2829_v34 }
 0xbc3   : > { %2646 = vmatprep.subr.bf16.mxu0 %v2957_v7 }
 0xc94   : > { %v1210_v38 = vpop.f32.mrb[16].mxu0 }
 0xc95   : > { %v1211_v39 = vadd.f32 %v2375_v37, %v1210_v38  ;;  %v2622_v40 = vpop.f32.mrb[17].mxu0 }
 0xc96   : > { %v1213_v42 = vpop.f32.mrb[18].mxu0 }
 0xc97   : > { %v1217_v43 = vmul.f32 0.044715, %v1211_v39  ;;  %v2623_v44 = vpop.f32.mrb[19].mxu0  ;;  %v1216_v50 = vmul.f32 0.5, %v1211_v39 }
 0xc99   : > { %v1218_v45 = vmul.f32 %v1217_v43, %v1211_v39 }
 0xc9b   : > { %v1219_v46 = vmul.f32 %v1218_v45, %v1211_v39 }
 0xc9d   : > { %v1220_v47 = vadd.f32 %v1219_v46, %v1211_v39 }
 0xc9f   : > { %v1221_v48 = vmul.f32 0.7978846, %v1220_v47 }
 0xca1   : > { %2865 = vtanh.f32 %v1221_v48 }
 0xcab   : > { %v2866_v49 = vpop.eup %2865 }
 0xcac   : > { %v1223_v51 = vadd.f32 1.0, %v2866_v49 }
 0xcae   : > { %v1224_v52 = vmul.f32 %v1223_v51, %v1216_v50 }
 0xcb0   : > { %v1225_v53 = vpack.c.bf16 %v1224_v52, %v1224_v52 }
 0xcb2   : > { %2641 = vmatmul.mubr.bf16.vlgmr.msra.gmra.mrb[28].mxu1 %v1225_v53 }
 0xcb3   : > { %2672 = vmatprep.mubr.msk.bf16.mxu1 %vm2958_vm0, %v2957_v7 }
 0xd85   : > { %v1328_v56 = vpop.f32.mrb[28].mxu1 }
 0xd86   : > { %v1329_v57 = vadd.f32 %v1328_v56, %v1245_v55  ;;  %v2642_v58 = vpop.f32.mrb[29].mxu1 }
 0xd87   : > { %v1331_v59 = vpop.f32.mrb[30].mxu1 }
 0xd88   : > { %v3340_v61 = vadd.f32 %v1329_v57, %v3276_v2  ;;  %v2643_v63 = vpop.f32.mrb[31].mxu1  ;;  %v2830_v2 = vld [vmem:[%s3599_s4 + $0x18] sm:$0xff]  }
 0xd89   : > { %2647 = vmatpush3.bf16.msra.mxu0 %v2830_v2 }
 0xd8a   : > { %v1341_v0 = vsel %vm482_vm3, %v3340_v61, 0.0  ;;  %2652 = vmatprep.subr.bf16.mxu0 %v2957_v7 }
 0xd8b   : > { %1342 = vadd.xlane.f32.xlu0 %v1341_v0 }
 0xda1   : > { %1435 = vrot.lane.b32.xlu0 %v1433_v8, %s2959_s22  ;;  %s3624_s22 = smov 120  }
 0xda5   : > { %1444 = vrot.lane.b32.xlu0 %v1442_v10, %s2960_s24 }
 0xe18   : > { %v1343_v31 = vpop.xlane.xlu0 %1342 }
 0xe19   : > { %v1344_v1 = vmul.f32 0.03125, %v1343_v31 }
 0xe1b   : > { %v1345_v3 = vsub.f32 %v3340_v61, %v1344_v1 }
 0xe1c   : > { %v1436_v35 = vpop.permute.xlu0 %1435 }
 0xe1d   : > { %v1346_v4 = vmul.f32 %v1345_v3, %v1345_v3 }
 0xe1f   : > { %v1347_v5 = vsel %vm482_vm3, %v1346_v4, 0.0 }
 0xe20   : > { %1348 = vadd.xlane.f32.xlu1 %v1347_v5  ;;  %v1445_v45 = vpop.permute.xlu0 %1444 }
 0xead   : > { %v1349_v11 = vpop.xlane.xlu1 %1348 }
 0xeae   : > { %v1350_v12 = vmul.f32 0.03125, %v1349_v11 }
 0xeb0   : > { %v1351_v22 = vadd.f32 1e-05, %v1350_v12 }
 0xeb2   : > { %2867 = vrsqrt.f32 %v1351_v22 }
 0xebc   : > { %v2868_v15 = vpop.eup %2867 }
 0xebd   : > { %v1353_v16 = vmul.f32 %v2868_v15, %v1345_v3 }
 0xebf   : > { %v1358_v18 = vmul.f32 %v1357_v14, %v1353_v16 }
 0xec1   : > { %v1363_v19 = vadd.f32 %v1362_v17, %v1358_v18 }
 0xec3   : > { %v1364_v20 = vpack.c.bf16 %v1363_v19, %v1363_v19 }
 0xec5   : > { %2649 = vmatmul.mubr.msk.bf16.vlgmr.msra.gmra.mrb[20].mxu0 %vm482_vm3, %v1364_v20 }
 0xec6   : > { %2654 = vmatprep.mubr.msk.bf16.mxu0 %vm2958_vm0, %v2957_v7 }
 0xf98   : > { %v1419_v21 = vpop.f32.mrb[20].mxu0 }
 0xf99   : > { %v1438_v23 = vadd.f32 %v1436_v35, %v1419_v21  ;;  %v2650_v24 = vpop.f32.mrb[21].mxu0  ;;  %v1429_v30 = vadd.f32 %v1428_v27, %v1419_v21  ;;  %v1447_v46 = vadd.f32 %v1445_v45, %v1419_v21 }
 0xf9a   : > { %v1422_v9 = vpop.f32.mrb[22].mxu0 }
 0xf9b   : > { %v1449_v25 = vpack.c.bf16 %v1438_v23, %v1438_v23  ;;  %v2651_v26 = vpop.f32.mrb[23].mxu0  ;;  %v1448_v36 = vpack.c.bf16 %v1429_v30, %v1429_v30  ;;  %v3385_v47 = vpack.c.bf16 %v1447_v46, %v1447_v46 }
 0xf9d   : > { %1452 = vrot.lane.b32.xlu1 %v1449_v25, %s2961_s25  ;;  %s3625_s25 = smov 80  }
0x100f   : > { %v1453_v28 = vpop.permute.xlu1 %1452 }
0x1010   : > { %v1458_v29 = vsel %vm596_vm4, %v1453_v28, 0 }
0x1011   : > { %2653 = vmatpush3.bf16.xpose.msra.mxu0 %v1458_v29 }
0x1012   : > { %2658 = vmatprep.subr.bf16.mxu0 %v2957_v7 }
0x1018   : > { %2655 = vmatmul.mubr.msk.bf16.vlgmr.msra.gmra.mrb[24].mxu0 %vm596_vm4, %v1448_v36 }
0x1019   : > { %2660 = vmatprep.mubr.msk.bf16.mxu0 %vm2958_vm0, %v2957_v7 }
0x10eb   : > { %v1494_v37 = vpop.f32.mrb[24].mxu0 }
0x10ec   : > { %v1500_v38 = vmul.f32 0.35355338, %v1494_v37  ;;  %v2656_v39 = vpop.f32.mrb[25].mxu0 }
0x10ed   : > { %v1497_v40 = vpop.f32.mrb[26].mxu0 }
0x10ee   : > { %v2657_v42 = vpop.f32.mrb[27].mxu0  ;;  %v1501_v43 = vsel %vm3180_vm5, %v1500_v38, -1e+30 }
0x10ef   : > { %v1502_v44 = vsel %vm596_vm4, %v1501_v43, -inf }
0x10f0   : > { %1503 = vmax.xlane.f32.xlu1 %v1502_v44 }
0x1101   : > { %1515 = vrot.lane.b32.xlu1 %v3385_v47, %s2960_s24  ;;  %s3627_s24 = smov 88  }
0x1105   : > { %1564 = vrot.lane.b32.xlu1 %v1448_v36, %s3624_s22  ;;  %s3633_s22 = smov 8  }
0x1109   : > { %1678 = vrot.lane.b32.xlu1 %v1449_v25, %s3625_s25  ;;  %s3634_s25 = smov 16  }
0x110d   : > { %1790 = vrot.lane.b32.xlu1 %v1449_v25, %s3626_s14  ;;  %s375_s14 = sand.u32 1, %s2945_s18  }
0x110e   : > { %s2280_s15 = scalar_lea.sflag [#allocation3], %s375_s14 }
0x117d   : > { %v1504_v48 = vpop.xlane.xlu1 %1503 }
0x117e   : > { %v1505_v49 = vsub.f32 %v1501_v43, %v1504_v48 }
0x1180   : > { %v1506_v50 = vmul.f32 1.442695, %v1505_v49 }
0x1181   : > { %v1516_v51 = vpop.permute.xlu1 %1515 }
0x1182   : > { %2869 = vpow2.f32 %v1506_v50  ;;  %v1521_v52 = vsel %vm663_vm6, %v1516_v51, 0 }
0x1183   : > { %2659 = vmatpush3.bf16.msra.mxu0 %v1521_v52 }
0x1184   : > { %2664 = vmatprep.subr.bf16.mxu0 %v2957_v7 }
0x1185   : > { %v1565_v0 = vpop.permute.xlu1 %1564 }
0x1189   : > { %v1679_v1 = vpop.permute.xlu1 %1678 }
0x118a   : > { %v1684_v3 = vsel %vm596_vm4, %v1679_v1, 0 }
0x118c   : > { %v2870_v53 = vpop.eup %2869 }
0x118d   : > { %v1508_v55 = vsel %vm596_vm4, %v2870_v53, 0.0  ;;  %v1791_v4 = vpop.permute.xlu1 %1790 }
0x118e   : > { %1509 = vadd.xlane.f32.xlu0 %v1508_v55  ;;  %v1796_v34 = vsel %vm596_vm4, %v1791_v4, 0 }
0x11a4   : > { %1566 = vrot.lane.b32.xlu0 %v1449_v25, %s3627_s24  ;;  %s2356_s24 = sshll.u32 %s375_s14, 3 }
0x11a8   : > { %1676 = vrot.lane.b32.xlu0 %v1448_v36, %s3628_s16  ;;  %s3635_s16 = smov 24  }
0x11ac   : > { %1788 = vrot.lane.b32.xlu0 %v1448_v36, %s3629_s29 }
0x121b   : > { %v1510_v56 = vpop.xlane.xlu0 %1509 }
0x121c   : > { %2871 = vrcp.f32 %v1510_v56 }
0x121f   : > { %v1567_v59 = vpop.permute.xlu0 %1566 }
0x1220   : > { %v1572_v31 = vsel %vm596_vm4, %v1567_v59, 0 }
0x1223   : > { %v1677_v5 = vpop.permute.xlu0 %1676 }
0x1226   : > { %v2872_v57 = vpop.eup %2871 }
0x1227   : > { %v1512_v58 = vmul.f32 %v2872_v57, %v2870_v53  ;;  %v1789_v2 = vpop.permute.xlu0 %1788 }
0x1229   : > { %v1513_v63 = vpack.c.bf16 %v1512_v58, %v1512_v58 }
0x122b   : > { %2661 = vmatmul.mubr.msk.bf16.vlgmr.msra.gmra.mrb[28].mxu0 %vm596_vm4, %v1513_v63 }
0x122c   : > { %2665 = vmatpush3.bf16.xpose.msra.mxu0 %v1572_v31  ;;  %2666 = vmatprep.mubr.msk.bf16.mxu0 %vm2958_vm0, %v2957_v7 }
0x122d   : > { %2676 = vmatprep.subr.bf16.mxu0 %v2957_v7 }
0x1233   : > { %2667 = vmatmul.mubr.msk.bf16.vlgmr.msra.gmra.mrb[32].mxu0 %vm596_vm4, %v1565_v0 }
0x1234   : > { %2677 = vmatpush3.bf16.xpose.msra.mxu0 %v1684_v3  ;;  %2678 = vmatprep.mubr.msk.bf16.mxu0 %vm2958_vm0, %v2957_v7 }
0x1235   : > { %2688 = vmatprep.subr.bf16.mxu0 %v2957_v7 }
0x123b   : > { %2679 = vmatmul.mubr.msk.bf16.vlgmr.msra.gmra.mrb[36].mxu0 %vm596_vm4, %v1677_v5 }
0x123c   : > { %2689 = vmatpush3.bf16.xpose.msra.mxu0 %v1796_v34  ;;  %2690 = vmatprep.mubr.msk.bf16.mxu0 %vm2958_vm0, %v2957_v7 }
0x123d   : > { %2700 = vmatprep.subr.bf16.mxu0 %v2957_v7 }
0x1243   : > { %2691 = vmatmul.mubr.msk.bf16.vlgmr.msra.gmra.mrb[40].mxu0 %vm596_vm4, %v1789_v2 }
0x1244   : > { %2704 = vmatprep.mubr.msk.bf16.mxu0 %vm2958_vm0, %v2957_v7 }
0x12fe   : > { %v3416_v8 = vpop.f32.mrb[28].mxu0 }
0x12ff   : > { %v2662_v10 = vpop.f32.mrb[29].mxu0 }
0x1300   : > { %v1560_v11 = vpop.f32.mrb[30].mxu0 }
0x1301   : > { %v2663_v12 = vpop.f32.mrb[31].mxu0 }
0x1302   : > { %v2831_v12 = vld [vmem:[%s3601_s6 + $0x10] sm:$0xff]  }
0x1303   : > { %2701 = vmatpush3.bf16.msra.mxu0 %v2831_v12 }
0x1304   : > { %2702 = vmatprep.subr.bf16.mxu0 %v2957_v7 }
0x1306   : > { %v1608_v22 = vpop.f32.mrb[32].mxu0 }
0x1307   : > { %v1614_v13 = vmul.f32 0.35355338, %v1608_v22  ;;  %v2668_v14 = vpop.f32.mrb[33].mxu0 }
0x1308   : > { %v1611_v15 = vpop.f32.mrb[34].mxu0 }
0x1309   : > { %v2669_v16 = vpop.f32.mrb[35].mxu0  ;;  %v1615_v17 = vsel %vm3180_vm5, %v1614_v13, -1e+30 }
0x130a   : > { %v1616_v18 = vsel %vm596_vm4, %v1615_v17, -inf }
0x130b   : > { %1617 = vmax.xlane.f32.xlu1 %v1616_v18 }
0x130e   : > { %v1720_v19 = vpop.f32.mrb[36].mxu0 }
0x130f   : > { %v1726_v20 = vmul.f32 0.35355338, %v1720_v19  ;;  %v2680_v35 = vpop.f32.mrb[37].mxu0 }
0x1310   : > { %v1723_v21 = vpop.f32.mrb[38].mxu0 }
0x1311   : > { %v2681_v23 = vpop.f32.mrb[39].mxu0  ;;  %v1727_v24 = vsel %vm3180_vm5, %v1726_v20, -1e+30  ;;  %v2832_v20 = vld [vmem:[%s3601_s6 + $0x18] sm:$0xff]  }
0x1312   : > { %v1728_v9 = vsel %vm596_vm4, %v1727_v24, -inf  ;;  %2703 = vmatpush3.bf16.msra.mxu0 %v2832_v20 }
0x1313   : > { %1729 = vmax.xlane.f32.xlu0 %v1728_v9  ;;  %2716 = vmatprep.subr.bf16.mxu0 %v2957_v7 }
0x1316   : > { %v1832_v25 = vpop.f32.mrb[40].mxu0 }
0x1317   : > { %v1838_v26 = vmul.f32 0.35355338, %v1832_v25  ;;  %v2692_v27 = vpop.f32.mrb[41].mxu0 }
0x1318   : > { %v1835_v28 = vpop.f32.mrb[42].mxu0 }
0x1319   : > { %v2693_v29 = vpop.f32.mrb[43].mxu0  ;;  %v1839_v30 = vsel %vm3180_vm5, %v1838_v26, -1e+30 }
0x131a   : > { %v1840_v36 = vsel %vm596_vm4, %v1839_v30, -inf }
0x131b   : > { %1841 = vmax.xlane.f32.xlu0 %v1840_v36  ;;  %v1924_v36 = vrot.slane %v3357_v6, %v1068_v60  ;;  %v2833_v60 = vld [vmem:[%s3602_s7 + $0x10] sm:$0xff]  }
0x1398   : > { %v1618_v37 = vpop.xlane.xlu1 %1617 }
0x1399   : > { %v1619_v38 = vsub.f32 %v1615_v17, %v1618_v37 }
0x139b   : > { %v1620_v39 = vmul.f32 1.442695, %v1619_v38 }
0x139d   : > { %2873 = vpow2.f32 %v1620_v39 }
0x13a0   : > { %v1730_v40 = vpop.xlane.xlu0 %1729 }
0x13a1   : > { %v1731_v42 = vsub.f32 %v1727_v24, %v1730_v40 }
0x13a3   : > { %v1732_v43 = vmul.f32 1.442695, %v1731_v42 }
0x13a5   : > { %2875 = vpow2.f32 %v1732_v43 }
0x13a7   : > { %v2874_v44 = vpop.eup %2873 }
0x13a8   : > { %v1622_v45 = vsel %vm596_vm4, %v2874_v44, 0.0  ;;  %v1842_v62 = vpop.xlane.xlu0 %1841 }
0x13a9   : > { %1623 = vadd.xlane.f32.xlu1 %v1622_v45  ;;  %v1843_v49 = vsub.f32 %v1839_v30, %v1842_v62 }
0x13ab   : > { %v1844_v50 = vmul.f32 1.442695, %v1843_v49  ;;  %v2835_v49 = vld [vmem:[%s3603_s8 + $0x40] sm:$0xff]  }
0x13ad   : > { %2877 = vpow2.f32 %v1844_v50 }
0x13af   : > { %v2876_v46 = vpop.eup %2875 }
0x13b0   : > { %v1734_v48 = vsel %vm596_vm4, %v2876_v46, 0.0 }
0x13b1   : > { %1735 = vadd.xlane.f32.xlu0 %v1734_v48 }
0x13b7   : > { %v2878_v51 = vpop.eup %2877 }
0x13b8   : > { %v1846_v52 = vsel %vm596_vm4, %v2878_v51, 0.0 }
0x13ba   : > { %1740 = vrot.lane.b32.xlu1 %v3385_v47, %s3630_s26  ;;  %s2450_s26 = sshll.u32 %s3056_s21, 7  ;;  %s2974_s21 = smov [#allocation2]  }
0x13bb   : > { %s3555_s13 = scalar_lea.hbm %s3606_s11, %s2450_s26 }
0x13c7   : > { %1628 = vrot.lane.b32.xlu0 %v3385_v47, %s3631_s30 }
0x13de   : > { %1847 = vadd.xlane.f32.xlu1 %v1846_v52 }
0x13ef   : > { %1852 = vrot.lane.b32.xlu1 %v3385_v47, %s3632_s12 }
0x1436   : > { %v1624_v53 = vpop.xlane.xlu1 %1623 }
0x1437   : > { %2879 = vrcp.f32 %v1624_v53  ;;  %v2388_v53 = vld [vmem:[%s3598_s3 + $0x6] sm:$0x3] }
0x143a   : > { %v1741_v63 = vpop.permute.xlu1 %1740 }
0x143b   : > { %v1746_v31 = vsel %vm663_vm6, %v1741_v63, 0 }
0x143e   : > { %v1736_v55 = vpop.xlane.xlu0 %1735 }
0x143f   : > { %2881 = vrcp.f32 %v1736_v55  ;;  %v1997_v55 = vrot.slane %v2388_v53, %v3160_v41 }
0x1441   : > { %v2880_v56 = vpop.eup %2879 }
0x1442   : > { %v1626_v57 = vmul.f32 %v2880_v56, %v2874_v44  ;;  %v1629_v58 = vpop.permute.xlu0 %1628 }
0x1443   : > { %v1634_v59 = vsel %vm663_vm6, %v1629_v58, 0  ;;  %v2002_v58 = vrot.slane %v2388_v53, %v3144_v33 }
0x1444   : > { %2671 = vmatpush3.bf16.msra.mxu1 %v1634_v59  ;;  %v1627_v0 = vpack.c.bf16 %v1626_v57, %v1626_v57 }
0x1445   : > { %2682 = vmatprep.subr.bf16.mxu1 %v2957_v7 }
0x1447   : > { %2673 = vmatmul.mubr.msk.bf16.vlgmr.msra.gmra.mrb[32].mxu1 %vm596_vm4, %v1627_v0 }
0x1448   : > { %2683 = vmatpush3.bf16.msra.mxu1 %v1746_v31  ;;  %2684 = vmatprep.mubr.msk.bf16.mxu1 %vm2958_vm0, %v2957_v7  ;;  %v2836_v31 = vld [vmem:[%s3603_s8 + $0x48] sm:$0xff]  }
0x1449   : > { %v2882_v47 = vpop.eup %2881  ;;  %2694 = vmatprep.subr.bf16.mxu1 %v2957_v7 }
0x144a   : > { %v1738_v1 = vmul.f32 %v2882_v47, %v2876_v46  ;;  %v2837_v47 = vld [vmem:[%s3603_s8 + $0x50] sm:$0xff]  }
0x144c   : > { %v1739_v3 = vpack.c.bf16 %v1738_v1, %v1738_v1  ;;  %v2838_v1 = vld [vmem:[%s3603_s8 + $0x58] sm:$0xff]  }
0x144f   : > { %2685 = vmatmul.mubr.msk.bf16.vlgmr.msra.gmra.mrb[36].mxu1 %vm596_vm4, %v1739_v3  ;;  %v2839_v3 = vld [vmem:[%s3603_s8 + $0x60] sm:$0xff]  }
0x1450   : > { %2696 = vmatprep.mubr.msk.bf16.mxu1 %vm2958_vm0, %v2957_v7 }
0x146b   : > { %v1848_v4 = vpop.xlane.xlu1 %1847 }
0x146c   : > { %2883 = vrcp.f32 %v1848_v4  ;;  %v2840_v4 = vld [vmem:[%s3603_s8 + $0x68] sm:$0xff]  }
0x146f   : > { %v1853_v5 = vpop.permute.xlu1 %1852 }
0x1470   : > { %v1858_v34 = vsel %vm663_vm6, %v1853_v5, 0  ;;  %v2841_v5 = vld [vmem:[%s3603_s8 + $0x70] sm:$0xff]  }
0x1471   : > { %2695 = vmatpush3.bf16.msra.mxu1 %v1858_v34  ;;  %v2842_v34 = vld [vmem:[%s3603_s8 + $0x78] sm:$0xff]  }
0x1472   : > { %2708 = vmatprep.subr.bf16.mxu1 %v2957_v7 }
0x1476   : > { %v2884_v2 = vpop.eup %2883 }
0x1477   : > { %v1850_v10 = vmul.f32 %v2884_v2, %v2878_v51  ;;  %v2417_v2 = vld [vmem:[%s3604_s9 + $0x1] ss:$0 sm:$0xff] }
0x1479   : > { %v1851_v11 = vpack.c.bf16 %v1850_v10, %v1850_v10 }
0x147b   : > { %2697 = vmatmul.mubr.msk.bf16.vlgmr.msra.gmra.mrb[40].mxu1 %vm596_vm4, %v1851_v11 }
0x147c   : > { %2712 = vmatprep.mubr.msk.bf16.mxu1 %vm2958_vm0, %v2957_v7  ;;  %2709 = vmatpush3.bf16.msra.mxu1 %v2833_v60 }
0x147d   : > { %2710 = vmatprep.subr.bf16.mxu1 %v2957_v7 }
0x151a   : > { %v1670_v22 = vpop.f32.mrb[32].mxu1 }
0x151b   : > { %1901 = vrot.lane.b32.xlu0 %v1670_v22, %s3633_s22  ;;  %v2674_v13 = vpop.f32.mrb[33].mxu1 }
0x151c   : > { %v1673_v14 = vpop.f32.mrb[34].mxu1 }
0x151d   : > { %v2675_v15 = vpop.f32.mrb[35].mxu1 }
0x1522   : > { %v1782_v16 = vpop.f32.mrb[36].mxu1 }
0x1523   : > { %1905 = vrot.lane.b32.xlu1 %v1782_v16, %s3634_s25  ;;  %v2686_v17 = vpop.f32.mrb[37].mxu1  ;;  %s2895_s25 = sshll.u32 %s2974_s21, 4  ;;  %s2896_s25 = int_to_ptr.vmem [resolvable:$false] %s2895_s25 }
0x1524   : > { %v1785_v18 = vpop.f32.mrb[38].mxu1 }
0x1525   : > { %v2687_v19 = vpop.f32.mrb[39].mxu1 }
0x154e   : > { %v1894_v35 = vpop.f32.mrb[40].mxu1 }
0x154f   : > { %1909 = vrot.lane.b32.xlu0 %v1894_v35, %s3635_s16  ;;  %v2698_v21 = vpop.f32.mrb[41].mxu1  ;;  %s377_s16 = scalar_lea.vmem [#allocation2], %s2356_s24  ;;  %s2897_s24 = scalar_lea.vmem %s2896_s25, 256 }
0x1550   : > { %v1897_v23 = vpop.f32.mrb[42].mxu1  ;;  %s2293_s29 = sshll.u32 %s377_s16, 4  ;;  %s3550_s29 = int_to_ptr.vmem [resolvable:$true] %s2293_s29 }
0x1551   : > { %v2699_v24 = vpop.f32.mrb[43].mxu1  ;;  %s2891_s22 = scalar_lea.vmem %s3550_s29, 128  ;;  %p2898_p0 = scmp.lt.s32.totalorder %s3550_s29, %s2896_s25 }
0x1552   : > { %v2103_v24 = vrot.slane %v3357_v6, %v1244_v54  ;;  %v2844_v54 = vld [vmem:[%s3605_s10 + $0x8] sm:$0xff]   ;;  %p2892_p11 = scmp.ne.s32.totalorder %s3550_s29, %s2891_s22  ;;  %p2899_p1 = scmp.lt.s32.totalorder %s2897_s24, %s2891_s22 }
0x1554   : > { %p2893_p12 = pnand %p2892_p11, %p3073_p5  ;;  %p2900_p2 = por %p2899_p1, %p2898_p0 }
0x1556   : > { %p2894_p13 = pneg %p2893_p12 }
0x1558   : > { %p2901_p3 = pnand %p2900_p2, %p2894_p13 }
0x158d   : > { %v1902_v9 = vpop.permute.xlu0 %1901 }
0x158e   : > { %v1912_v26 = vsel %vm596_vm4, %v3416_v8, %v1902_v9 }
0x1595   : > { %v1906_v25 = vpop.permute.xlu1 %1905 }
0x1596   : > { %v1913_v27 = vsel %vm1057_vm7, %v1912_v26, %v1906_v25 }
0x15c1   : > { %v1910_v28 = vpop.permute.xlu0 %1909 }
0x15c2   : > { %v1914_v29 = vsel %vm1059_vm8, %v1913_v27, %v1910_v28 }
0x15c3   : > { %v1915_v30 = vpack.c.bf16 %v1914_v29, %v1914_v29 }
0x15c5   : > { %2705 = vmatmul.mubr.msk.bf16.vlgmr.msra.gmra.mrb[44].mxu0 %vm482_vm3, %v1915_v30 }
0x15c6   : > { %2732 = vmatprep.mubr.msk.bf16.mxu0 %vm2958_vm0, %v2957_v7  ;;  %2717 = vmatpush3.bf16.msra.mxu0 %v2835_v49 }
0x15c7   : > { %2718 = vmatprep.subr.bf16.mxu0 %v2957_v7 }
0x15ca   : > { %2719 = vmatpush3.bf16.msra.mxu0 %v2836_v31 }
0x15cb   : > { %2720 = vmatprep.subr.bf16.mxu0 %v2957_v7 }
0x15ce   : > { %2721 = vmatpush3.bf16.msra.mxu0 %v2837_v47 }
0x15cf   : > { %2722 = vmatprep.subr.bf16.mxu0 %v2957_v7 }
0x15d2   : > { %2723 = vmatpush3.bf16.msra.mxu0 %v2838_v1 }
0x15d3   : > { %2724 = vmatprep.subr.bf16.mxu0 %v2957_v7 }
0x15d6   : > { %2725 = vmatpush3.bf16.msra.mxu0 %v2839_v3 }
0x15d7   : > { %2726 = vmatprep.subr.bf16.mxu0 %v2957_v7 }
0x15da   : > { %2727 = vmatpush3.bf16.msra.mxu0 %v2840_v4 }
0x15db   : > { %2728 = vmatprep.subr.bf16.mxu0 %v2957_v7 }
0x15de   : > { %2729 = vmatpush3.bf16.msra.mxu0 %v2841_v5 }
0x15df   : > { %2730 = vmatprep.subr.bf16.mxu0 %v2957_v7 }
0x15e2   : > { %2731 = vmatpush3.bf16.msra.mxu0 %v2842_v34 }
0x1698   : > { %v1974_v37 = vpop.f32.mrb[44].mxu0 }
0x1699   : > { %v1975_v38 = vadd.f32 %v1974_v37, %v1924_v36  ;;  %v2706_v39 = vpop.f32.mrb[45].mxu0 }
0x169a   : > { %v1977_v40 = vpop.f32.mrb[46].mxu0 }
0x169b   : > { %v3473_v8 = vadd.f32 %v1975_v38, %v3340_v61  ;;  %v2707_v42 = vpop.f32.mrb[47].mxu0  ;;  %v2834_v61 = vld [vmem:[%s3602_s7 + $0x18] sm:$0xff]  }
0x169c   : > { %2711 = vmatpush3.bf16.msra.mxu1 %v2834_v61 }
0x169d   : > { %v1981_v43 = vsel %vm482_vm3, %v3473_v8, 0.0  ;;  %2736 = vmatprep.subr.bf16.mxu1 %v2957_v7 }
0x169e   : > { %1982 = vadd.xlane.f32.xlu1 %v1981_v43  ;;  %v2445_v43 = vld [vmem:[%s3598_s3 + $0x8] sm:$0x3] }
0x172b   : > { %v1983_v44 = vpop.xlane.xlu1 %1982 }
0x172c   : > { %v1984_v45 = vmul.f32 0.03125, %v1983_v44  ;;  %v2211_v44 = vrot.slane %v2445_v43, %v3160_v41 }
0x172e   : > { %v1985_v46 = vsub.f32 %v3473_v8, %v1984_v45 }
0x1730   : > { %v1986_v48 = vmul.f32 %v1985_v46, %v1985_v46 }
0x1732   : > { %v1987_v62 = vsel %vm482_vm3, %v1986_v48, 0.0  ;;  %v2216_v48 = vrot.slane %v2445_v43, %v3144_v33 }
0x1733   : > { %1988 = vadd.xlane.f32.xlu0 %v1987_v62 }
0x17c0   : > { %v1989_v50 = vpop.xlane.xlu0 %1988 }
0x17c1   : > { %v1990_v51 = vmul.f32 0.03125, %v1989_v50 }
0x17c3   : > { %v1991_v52 = vadd.f32 1e-05, %v1990_v51 }
0x17c5   : > { %2885 = vrsqrt.f32 %v1991_v52 }
0x17cf   : > { %v2886_v56 = vpop.eup %2885 }
0x17d0   : > { %v1993_v57 = vmul.f32 %v2886_v56, %v1985_v46 }
0x17d2   : > { %v1998_v59 = vmul.f32 %v1997_v55, %v1993_v57 }
0x17d4   : > { %v2003_v63 = vadd.f32 %v2002_v58, %v1998_v59 }
0x17d6   : > { %v2004_v0 = vpack.c.bf16 %v2003_v63, %v2003_v63 }
0x17d8   : > { %2713 = vmatmul.mubr.msk.bf16.vlgmr.msra.gmra.mrb[44].mxu1 %vm482_vm3, %v2004_v0 }
0x17d9   : > { %2740 = vmatprep.mubr.msk.bf16.mxu1 %vm2958_vm0, %v2957_v7  ;;  %2737 = vmatpush3.bf16.msra.mxu1 %v2843_v32 }
0x17da   : > { %2738 = vmatprep.subr.bf16.mxu1 %v2957_v7 }
0x17dd   : > { %2739 = vmatpush3.bf16.msra.mxu1 %v2844_v54 }
0x18ab   : > { %v2067_v10 = vpop.f32.mrb[44].mxu1 }
0x18ac   : > { %v2068_v11 = vadd.f32 %v2417_v2, %v2067_v10  ;;  %v2714_v12 = vpop.f32.mrb[45].mxu1 }
0x18ad   : > { %v2070_v22 = vpop.f32.mrb[46].mxu1 }
0x18ae   : > { %v2074_v13 = vmul.f32 0.044715, %v2068_v11  ;;  %v2715_v14 = vpop.f32.mrb[47].mxu1  ;;  %v2073_v20 = vmul.f32 0.5, %v2068_v11 }
0x18b0   : > { %v2075_v15 = vmul.f32 %v2074_v13, %v2068_v11 }
0x18b2   : > { %v2076_v16 = vmul.f32 %v2075_v15, %v2068_v11 }
0x18b4   : > { %v2077_v17 = vadd.f32 %v2076_v16, %v2068_v11 }
0x18b6   : > { %v2078_v18 = vmul.f32 0.7978846, %v2077_v17 }
0x18b8   : > { %2887 = vtanh.f32 %v2078_v18 }
0x18c2   : > { %v2888_v19 = vpop.eup %2887 }
0x18c3   : > { %v2080_v35 = vadd.f32 1.0, %v2888_v19 }
0x18c5   : > { %v2081_v21 = vmul.f32 %v2080_v35, %v2073_v20 }
0x18c7   : > { %v2082_v23 = vpack.c.bf16 %v2081_v21, %v2081_v21 }
0x18c9   : > { %2733 = vmatmul.mubr.bf16.vlgmr.msra.gmra.mrb[48].mxu0 %v2082_v23 }
0x199c   : > { %v2186_v9 = vpop.f32.mrb[48].mxu0 }
0x199d   : > { %v2187_v25 = vadd.f32 %v2186_v9, %v2103_v24  ;;  %v2734_v26 = vpop.f32.mrb[49].mxu0 }
0x199e   : > { %v2189_v27 = vpop.f32.mrb[50].mxu0 }
0x199f   : > { %v2735_v28 = vpop.f32.mrb[51].mxu0  ;;  %v2192_v29 = vadd.f32 %v2187_v25, %v3473_v8 }
0x19a1   : > { %v2195_v30 = vsel %vm482_vm3, %v2192_v29, 0.0 }
0x19a2   : > { %2196 = vadd.xlane.f32.xlu0 %v2195_v30 }
0x1a2f   : > { %v2197_v36 = vpop.xlane.xlu0 %2196 }
0x1a30   : > { %v2198_v37 = vmul.f32 0.03125, %v2197_v36 }
0x1a32   : > { %v2199_v38 = vsub.f32 %v2192_v29, %v2198_v37 }
0x1a34   : > { %v2200_v39 = vmul.f32 %v2199_v38, %v2199_v38 }
0x1a36   : > { %v2201_v40 = vsel %vm482_vm3, %v2200_v39, 0.0 }
0x1a37   : > { %2202 = vadd.xlane.f32.xlu1 %v2201_v40 }
0x1ac4   : > { %v2203_v6 = vpop.xlane.xlu1 %2202 }
0x1ac5   : > { %v2204_v8 = vmul.f32 0.03125, %v2203_v6 }
0x1ac7   : > { %v2205_v42 = vadd.f32 1e-05, %v2204_v8 }
0x1ac9   : > { %2889 = vrsqrt.f32 %v2205_v42 }
0x1ad3   : > { %v2890_v45 = vpop.eup %2889 }
0x1ad4   : > { %v2207_v46 = vmul.f32 %v2890_v45, %v2199_v38 }
0x1ad6   : > { %v2212_v62 = vmul.f32 %v2211_v44, %v2207_v46 }
0x1ad8   : > { %v2217_v60 = vadd.f32 %v2216_v48, %v2212_v62 }
0x1ada   : > { %v2218_v61 = vpack.c.bf16 %v2217_v60, %v2217_v60 }
0x1adc   : > { %2741 = vmatmul.mubr.msk.bf16.vlgmr.msra.gmra.mrb[48].mxu1 %vm482_vm3, %v2218_v61 }
0x1baf   : > { %v2272_v7 = vpop.f32.mrb[48].mxu1 }
0x1bb0   : > { %2278 = vst [vmem:[%s377_s16] sm:$0xff] %v2272_v7  ;;  %v2742_v33 = vpop.f32.mrb[49].mxu1 }
0x1bb1   : > { %v2275_v41 = vpop.f32.mrb[50].mxu1 }
0x1bb2   : > { %2904 = shalt.err (!%p2901_p3)
}
0x1bb3   : > { %s2905_s14 = scalar_lea.hbm %s3555_s13, 128  ;;  %s2909_s30 = scalar_lea.hbm %s3606_s11, 256 }
0x1bb4   : > { %p2906_p4 = scmp.ne.s32.totalorder %s3555_s13, %s2905_s14  ;;  %p2910_p9 = scmp.lt.u32.totalorder %s3555_s13, %s3606_s11 }
0x1bb5   : > { %p2911_p10 = scmp.lt.u32.totalorder %s2909_s30, %s2905_s14  ;;  %p2913_p12 = scmp.lt.u32.totalorder %s2905_s14, %s3555_s13 }
0x1bb6   : > { %p2907_p7 = pnand %p2906_p4, %p3073_p5 }
0x1bb7   : > { %p2912_p11 = por %p2911_p10, %p2910_p9 }
0x1bb8   : > { %p2908_p8 = pneg %p2907_p7 }
0x1bb9   : > { %p2914_p13 = por %p2913_p12, %p2912_p11 }
0x1bbb   : > { %p2915_p0 = pnand %p2914_p13, %p2908_p8 }
0x1bbd   : > { %2918 = shalt.err (!%p2915_p0)
}
0x1bbe   : > { %2756 = dma.vmem_to_hbm [thread:$0]  (%p3073_p5), %s3550_s29, 128, %s3555_s13, %s2280_s15   ;;  %v2743_v49 = vpop.f32.mrb[51].mxu1 }
0x1bbf PF: > { %p2762_p1 = scmp.ge.s32.totalorder %s2953_s20, 2  ;;  %s2305_s22 = sand.u32 1, %s2941_s17  }
0x1bc0   : > { %s2306_s25 = scalar_lea.sflag [#allocation3], %s2305_s22 }
0x1bc1   : > { %p2759_p2 = pnand %p2762_p1, %p3077_p6 }
0x1bc3   : > { %2936 = dma.done.wait (!%p2759_p2), %s2306_s25, 128  }
0x1bc4   : > { %2938 = vsyncadd (!%p2759_p2), %s2306_s25, 4294967168  ;;  %s3636_s24 = sld [smem:[#allocation5_spill]]  ;;  %p21_p3 = scmp.ge.s32.totalorder %s3060_s23, 4  }
0x1bc5   : > { %s3637_s17 = smov %s2945_s18  ;;  %s3638_s18 = smov %s2949_s19 }
0x1bc6   : > { %s3640_s20 = smov %s3060_s23  ;;  %23 = sbr.rel (!%p21_p3) target bundleno = 3 (0x3), region = 109 }
0x1bca   : > { %s3639_s19 = smov %s3636_s24 }
0x1bcd   :  { %2311 = vsyncpa [#allocation3], 1 }
0x1bce   :  { %2313 = vsyncpa [#allocation3 + $0x1], 1 }

</bundles_post_ra>
